<compile_context>
chip_gen: v7x
topology: tpu7x:2x2x1
jax: 0.10.0
libtpu: 0.0.40
codegen_flags: <defaults>
</compile_context>

<pallas_src>
import numpy as np
import jax
import jax.numpy as jnp
from jax.experimental import pallas as pl
from jax.experimental.pallas import tpu as pltpu

# ----- Deterministic synthetic config (MelSpectrogramConfig) -----
SR = 8000
N_FFT = 64
WIN_LENGTH = 64
HOP_LENGTH = 16
F_MIN = 0.0
F_MAX = 4000.0
N_MELS = 16
POWER = 1.0          # torchaudio spectrogram.power (1.0 -> magnitude)
CLAMP_MIN = 1e-5

N_FREQ = N_FFT // 2 + 1                 # 33 one-sided bins
NF_PAD = ((N_FREQ + 7) // 8) * 8        # 40: sublane-aligned frequency rows
N_SHIFT = N_FFT // HOP_LENGTH           # 4 hop chunks per frame
MAX_TILE_T = 512                        # frames per grid step (lane axis), mult of 128


def _round_up(x, m):
    return ((x + m - 1) // m) * m


# ----------------- parameter construction (plain numpy, deterministic) -----------------
def _hz_to_mel_slaney(f):
    f = np.asarray(f, dtype=np.float64)
    f_sp = 200.0 / 3
    mels = f / f_sp
    min_log_hz = 1000.0
    min_log_mel = min_log_hz / f_sp
    logstep = np.log(6.4) / 27.0
    return np.where(
        f >= min_log_hz,
        min_log_mel + np.log(np.maximum(f, min_log_hz) / min_log_hz) / logstep,
        mels,
    )


def _mel_to_hz_slaney(m):
    m = np.asarray(m, dtype=np.float64)
    f_sp = 200.0 / 3
    freqs = m * f_sp
    min_log_hz = 1000.0
    min_log_mel = min_log_hz / f_sp
    logstep = np.log(6.4) / 27.0
    return np.where(
        m >= min_log_mel,
        min_log_hz * np.exp(logstep * (m - min_log_mel)),
        freqs,
    )


def mel_filterbank(sr, n_fft, n_mels, fmin, fmax):
    """librosa.filters.mel(htk=False, norm='slaney').T -> (n_freq, n_mels), matches the fb
    copied into torchaudio MelScale in the reference module."""
    n_freq = n_fft // 2 + 1
    fftfreqs = np.linspace(0.0, sr / 2.0, n_freq)
    mel_pts = np.linspace(_hz_to_mel_slaney(fmin), _hz_to_mel_slaney(fmax), n_mels + 2)
    mel_f = _mel_to_hz_slaney(mel_pts)
    fdiff = np.diff(mel_f)
    ramps = mel_f[:, None] - fftfreqs[None, :]
    lower = -ramps[:-2] / fdiff[:-1, None]
    upper = ramps[2:] / fdiff[1:, None]
    weights = np.maximum(0.0, np.minimum(lower, upper))
    enorm = 2.0 / (mel_f[2:n_mels + 2] - mel_f[:n_mels])  # slaney norm
    weights = weights * enorm[:, None]
    return weights.T.astype(np.float32)  # (n_freq, n_mels)


def windowed_dft_matrices(n_fft, win_length):
    """Hann window (torch periodic hann) folded into real/imag one-sided DFT matrices."""
    n = np.arange(win_length)
    win = 0.5 * (1.0 - np.cos(2.0 * np.pi * n / win_length))
    if win_length < n_fft:
        w = np.zeros(n_fft)
        pad_l = (n_fft - win_length) // 2
        w[pad_l:pad_l + win_length] = win
    else:
        w = win
    nn = np.arange(n_fft)[:, None].astype(np.float64)
    kk = np.arange(n_fft // 2 + 1)[None, :].astype(np.float64)
    ang = 2.0 * np.pi * nn * kk / n_fft
    cos_m = (w[:, None] * np.cos(ang)).astype(np.float32)   # (n_fft, n_freq)
    sin_m = (-w[:, None] * np.sin(ang)).astype(np.float32)  # (n_fft, n_freq)
    return cos_m, sin_m


def _constants():
    """Fused, transposed, padded constant matrices for the kernel."""
    cos_m, sin_m = windowed_dft_matrices(N_FFT, WIN_LENGTH)     # (64, 33) each
    # Fused [cos ; sin]^T, frequency rows zero-padded to NF_PAD for sublane alignment.
    w_full = np.zeros((2 * NF_PAD, N_FFT), dtype=np.float32)    # (80, 64)
    w_full[:N_FREQ] = cos_m.T
    w_full[NF_PAD:NF_PAD + N_FREQ] = sin_m.T
    # Pre-split into the 4 hop-offset slices so the kernel never needs unaligned
    # lane slices of the weight matrix.
    w_split = np.stack(
        [w_full[:, j * HOP_LENGTH:(j + 1) * HOP_LENGTH] for j in range(N_SHIFT)]
    )                                                           # (4, 80, 16)
    fb = mel_filterbank(SR, N_FFT, N_MELS, F_MIN, F_MAX)        # (33, 16)
    fb_t = np.zeros((N_MELS, NF_PAD), dtype=np.float32)         # (16, 40)
    fb_t[:, :N_FREQ] = fb.T
    return jnp.asarray(w_split), jnp.asarray(fb_t)


# ----------------- Pallas kernel -----------------
def mel_kernel(chunks_ref, w_ref, fb_ref, out_ref):
    # chunks_ref: (1, 1, hop, tile_t + n_shift - 1)  transposed hop-chunks (frames on lanes)
    # w_ref:      (n_shift, 2*nf_pad, hop)           fused windowed [cos ; sin] DFT slices
    # fb_ref:     (n_mels, nf_pad)                   transposed, zero-padded mel filterbank
    # out_ref:    (1, n_mels, tile_t)                lane-dense log-mel tile
    n_shift = w_ref.shape[0]
    nf_pad = w_ref.shape[1] // 2
    tile_t = out_ref.shape[-1]
    hp = jax.lax.Precision.HIGHEST

    c = chunks_ref[0, 0]                                   # (hop, tile_t + n_shift - 1)

    # Windowed one-sided DFT as a sum of shift-accumulated MXU matmuls:
    #   real/imag[:, i] = sum_j W_j @ c[:, i + j]
    ri = jnp.dot(w_ref[0], c[:, 0:tile_t],
                 preferred_element_type=jnp.float32, precision=hp)
    for j in range(1, n_shift):
        ri = ri + jnp.dot(w_ref[j], c[:, j:j + tile_t],
                          preferred_element_type=jnp.float32, precision=hp)

    real = ri[:nf_pad]                                     # (nf_pad, tile_t) sublane-aligned
    imag = ri[nf_pad:]
    pspec = real * real + imag * imag                      # power-2 spectrum (lane-dense)
    if POWER == 2.0:
        spec = pspec
    elif POWER == 1.0:
        spec = jnp.sqrt(pspec)                             # magnitude
    else:
        spec = pspec ** (POWER / 2.0)

    mel = jnp.dot(fb_ref[...], spec,
                  preferred_element_type=jnp.float32, precision=hp)   # (n_mels, tile_t)
    out_ref[0] = jnp.log(jnp.maximum(mel, CLAMP_MIN))


# ----------------- wrapper -----------------
def mel_spectrogram(audio: jax.Array) -> jax.Array:
    """audio: [B, T] float32 -> log-mel [B, n_mels, T']  (T' = 1 + T // hop)."""
    B, T = audio.shape
    pad = N_FFT // 2
    assert T > pad, "reflect padding (center=True) requires T > n_fft // 2"
    n_frames = 1 + T // HOP_LENGTH

    # Frame-axis tiling: multiple of 128 (lane-dense output), capped for VMEM on v7x/v5e.
    tile_t = min(MAX_TILE_T, _round_up(n_frames, 128))
    n_tiles = (n_frames + tile_t - 1) // tile_t
    n_frames_pad = n_tiles * tile_t
    ch_t = tile_t + N_SHIFT - 1      # hop chunks needed per frame tile (3-chunk halo)

    # center=True reflect padding (same as torch.stft / torchaudio).
    padded = jnp.pad(audio, ((0, 0), (pad, pad)), mode="reflect")
    need = (n_frames_pad + N_SHIFT - 1) * HOP_LENGTH
    if need > padded.shape[1]:
        padded = jnp.pad(padded, ((0, 0), (0, need - padded.shape[1])))

    # Per-tile transposed hop-chunks: chunks[b, t, m, c] = padded[b, (t*tile_t + c)*hop + m].
    # Only a 3-chunk halo per tile is duplicated (~1x audio traffic, vs 4x overlapped frames).
    sample_idx = ((np.arange(n_tiles)[:, None, None] * tile_t
                   + np.arange(ch_t)[None, None, :]) * HOP_LENGTH
                  + np.arange(HOP_LENGTH)[None, :, None]).astype(np.int32)
    chunks = padded[:, sample_idx]                         # (B, n_tiles, HOP, ch_t)

    w_split, fb_t = _constants()

    out = pl.pallas_call(
        mel_kernel,
        out_shape=jax.ShapeDtypeStruct((B, N_MELS, n_frames_pad), jnp.float32),
        grid_spec=pltpu.PrefetchScalarGridSpec(
            num_scalar_prefetch=0,
            grid=(B, n_tiles),
            in_specs=[
                pl.BlockSpec((1, 1, HOP_LENGTH, ch_t), lambda b, t: (b, t, 0, 0)),
                pl.BlockSpec((N_SHIFT, 2 * NF_PAD, HOP_LENGTH), lambda b, t: (0, 0, 0)),
                pl.BlockSpec((N_MELS, NF_PAD), lambda b, t: (0, 0)),
            ],
            out_specs=pl.BlockSpec((1, N_MELS, tile_t), lambda b, t: (b, 0, t)),
        ),
        compiler_params=pltpu.CompilerParams(
            dimension_semantics=("parallel", "parallel")),
    )(chunks, w_split, fb_t)

    # Drop lane padding; layout is already [B, n_mels, T'] (no transpose pass).
    return out[:, :, :n_frames]


# ----------------- pure numpy reference (float64) for the self-check -----------------
def _reference_logmel(audio_np: np.ndarray) -> np.ndarray:
    B, T = audio_np.shape
    pad = N_FFT // 2
    x = np.pad(audio_np.astype(np.float64), ((0, 0), (pad, pad)), mode="reflect")
    n_frames = 1 + T // HOP_LENGTH
    idx = np.arange(n_frames)[:, None] * HOP_LENGTH + np.arange(N_FFT)[None, :]
    frames = x[:, idx]                                     # (B, nT, n_fft)
    cos_m, sin_m = windowed_dft_matrices(N_FFT, WIN_LENGTH)
    fb = mel_filterbank(SR, N_FFT, N_MELS, F_MIN, F_MAX)
    real = frames @ cos_m.astype(np.float64)
    imag = frames @ sin_m.astype(np.float64)
    pspec = real ** 2 + imag ** 2
    spec = np.sqrt(pspec) if POWER == 1.0 else pspec ** (POWER / 2.0)
    mel = spec @ fb.astype(np.float64)                     # (B, nT, n_mels)
    mel = np.log(np.maximum(mel, CLAMP_MIN))
    return np.transpose(mel, (0, 2, 1)).astype(np.float32)


if __name__ == "__main__":
    key = jax.random.PRNGKey(0)
    B, T = 2, 256
    audio = jax.random.normal(key, (B, T), dtype=jnp.float32)

    mel = jax.block_until_ready(mel_spectrogram(audio))

    expected_frames = 1 + T // HOP_LENGTH
    assert mel.shape == (B, N_MELS, expected_frames), mel.shape
    assert mel.dtype == jnp.float32
    assert bool(jnp.all(jnp.isfinite(mel)))

    ref = _reference_logmel(np.asarray(audio))
    max_err = float(np.max(np.abs(np.asarray(mel) - ref)))
    assert max_err < 1e-2, f"max abs error vs reference: {max_err}"

    print("KERNEL_OK")
</pallas_src>

<mosaic_0001>
module attributes {stable_mosaic.version = 11 : i64} {
  func.func @mel_kernel(%arg0: i32, %arg1: i32, %arg2: memref<1x1x16x131xf32, #tpu.memory_space<vmem>>, %arg3: memref<4x80x16xf32, #tpu.memory_space<vmem>>, %arg4: memref<16x40xf32, #tpu.memory_space<vmem>>, %arg5: memref<1x16x128xf32, #tpu.memory_space<vmem>>) attributes {dimension_semantics = [#tpu.dimension_semantics<parallel>, #tpu.dimension_semantics<parallel>], iteration_bounds = array<i64: 2, 1>, scalar_prefetch = 0 : i64, scratch_operands = 0 : i64, tpu.core_type = #tpu.core_type<tc>, window_params = [{transform_indices = @transform_0, window_bounds = array<i64: 1, 1, 16, 131>}, {pipeline_mode = #tpu.pipeline_mode<synchronous>, transform_indices = @transform_1, window_bounds = array<i64: 4, 80, 16>}, {pipeline_mode = #tpu.pipeline_mode<synchronous>, transform_indices = @transform_2, window_bounds = array<i64: 16, 40>}, {transform_indices = @transform_3, window_bounds = array<i64: 1, 16, 128>}]} {
    %c0 = arith.constant 0 : index
    %c0_0 = arith.constant 0 : index
    %c0_1 = arith.constant 0 : index
    %c0_2 = arith.constant 0 : index
    %0 = vector.load %arg2[%c0, %c0_0, %c0_1, %c0_2] : memref<1x1x16x131xf32, #tpu.memory_space<vmem>>, vector<1x1x16x131xf32>
    %1 = vector.shape_cast %0 : vector<1x1x16x131xf32> to vector<16x131xf32>
    %c0_3 = arith.constant 0 : index
    %c0_4 = arith.constant 0 : index
    %c0_5 = arith.constant 0 : index
    %2 = vector.load %arg3[%c0_3, %c0_4, %c0_5] : memref<4x80x16xf32, #tpu.memory_space<vmem>>, vector<1x80x16xf32>
    %3 = vector.shape_cast %2 : vector<1x80x16xf32> to vector<80x16xf32>
    %4 = vector.extract_strided_slice %1 {offsets = [0, 0], sizes = [16, 128], strides = [1, 1]} : vector<16x131xf32> to vector<16x128xf32>
    %cst = arith.constant dense<0.000000e+00> : vector<80x128xf32>
    %5 = tpu.matmul %3, %4, %cst {dimension_numbers = #tpu.dot_dimension_numbers<[1], [0], [0], [1], [0, 0, 1, 1], [], []>, precision = #tpu.contract_precision<fp32>} : vector<80x16xf32>, vector<16x128xf32>, vector<80x128xf32> -> vector<80x128xf32>
    %c1 = arith.constant 1 : index
    %c0_6 = arith.constant 0 : index
    %c0_7 = arith.constant 0 : index
    %6 = vector.load %arg3[%c1, %c0_6, %c0_7] : memref<4x80x16xf32, #tpu.memory_space<vmem>>, vector<1x80x16xf32>
    %7 = vector.shape_cast %6 : vector<1x80x16xf32> to vector<80x16xf32>
    %8 = vector.extract_strided_slice %1 {offsets = [0, 1], sizes = [16, 128], strides = [1, 1]} : vector<16x131xf32> to vector<16x128xf32>
    %cst_8 = arith.constant dense<0.000000e+00> : vector<80x128xf32>
    %9 = tpu.matmul %7, %8, %cst_8 {dimension_numbers = #tpu.dot_dimension_numbers<[1], [0], [0], [1], [0, 0, 1, 1], [], []>, precision = #tpu.contract_precision<fp32>} : vector<80x16xf32>, vector<16x128xf32>, vector<80x128xf32> -> vector<80x128xf32>
    %10 = arith.addf %5, %9 : vector<80x128xf32>
    %c2 = arith.constant 2 : index
    %c0_9 = arith.constant 0 : index
    %c0_10 = arith.constant 0 : index
    %11 = vector.load %arg3[%c2, %c0_9, %c0_10] : memref<4x80x16xf32, #tpu.memory_space<vmem>>, vector<1x80x16xf32>
    %12 = vector.shape_cast %11 : vector<1x80x16xf32> to vector<80x16xf32>
    %13 = vector.extract_strided_slice %1 {offsets = [0, 2], sizes = [16, 128], strides = [1, 1]} : vector<16x131xf32> to vector<16x128xf32>
    %cst_11 = arith.constant dense<0.000000e+00> : vector<80x128xf32>
    %14 = tpu.matmul %12, %13, %cst_11 {dimension_numbers = #tpu.dot_dimension_numbers<[1], [0], [0], [1], [0, 0, 1, 1], [], []>, precision = #tpu.contract_precision<fp32>} : vector<80x16xf32>, vector<16x128xf32>, vector<80x128xf32> -> vector<80x128xf32>
    %15 = arith.addf %10, %14 : vector<80x128xf32>
    %c3 = arith.constant 3 : index
    %c0_12 = arith.constant 0 : index
    %c0_13 = arith.constant 0 : index
    %16 = vector.load %arg3[%c3, %c0_12, %c0_13] : memref<4x80x16xf32, #tpu.memory_space<vmem>>, vector<1x80x16xf32>
    %17 = vector.shape_cast %16 : vector<1x80x16xf32> to vector<80x16xf32>
    %18 = vector.extract_strided_slice %1 {offsets = [0, 3], sizes = [16, 128], strides = [1, 1]} : vector<16x131xf32> to vector<16x128xf32>
    %cst_14 = arith.constant dense<0.000000e+00> : vector<80x128xf32>
    %19 = tpu.matmul %17, %18, %cst_14 {dimension_numbers = #tpu.dot_dimension_numbers<[1], [0], [0], [1], [0, 0, 1, 1], [], []>, precision = #tpu.contract_precision<fp32>} : vector<80x16xf32>, vector<16x128xf32>, vector<80x128xf32> -> vector<80x128xf32>
    %20 = arith.addf %15, %19 : vector<80x128xf32>
    %21 = vector.extract_strided_slice %20 {offsets = [0, 0], sizes = [40, 128], strides = [1, 1]} : vector<80x128xf32> to vector<40x128xf32>
    %22 = vector.extract_strided_slice %20 {offsets = [40, 0], sizes = [40, 128], strides = [1, 1]} : vector<80x128xf32> to vector<40x128xf32>
    %23 = arith.mulf %21, %21 : vector<40x128xf32>
    %24 = arith.mulf %22, %22 : vector<40x128xf32>
    %25 = arith.addf %23, %24 : vector<40x128xf32>
    %26 = math.sqrt %25 : vector<40x128xf32>
    %c0_15 = arith.constant 0 : index
    %c0_16 = arith.constant 0 : index
    %27 = vector.load %arg4[%c0_15, %c0_16] : memref<16x40xf32, #tpu.memory_space<vmem>>, vector<16x40xf32>
    %cst_17 = arith.constant dense<0.000000e+00> : vector<16x128xf32>
    %28 = tpu.matmul %27, %26, %cst_17 {dimension_numbers = #tpu.dot_dimension_numbers<[1], [0], [0], [1], [0, 0, 1, 1], [], []>, precision = #tpu.contract_precision<fp32>} : vector<16x40xf32>, vector<40x128xf32>, vector<16x128xf32> -> vector<16x128xf32>
    %cst_18 = arith.constant 9.99999974E-6 : f32
    %29 = vector.broadcast %cst_18 : f32 to vector<16x128xf32>
    %30 = arith.maximumf %28, %29 : vector<16x128xf32>
    %31 = math.log %30 : vector<16x128xf32>
    %c0_19 = arith.constant 0 : index
    %c0_20 = arith.constant 0 : index
    %c0_21 = arith.constant 0 : index
    %32 = vector.load %arg5[%c0_19, %c0_20, %c0_21] : memref<1x16x128xf32, #tpu.memory_space<vmem>>, vector<1x16x128xf32>
    %33 = vector.shape_cast %32 : vector<1x16x128xf32> to vector<16x128xf32>
    %34 = vector.shape_cast %31 : vector<16x128xf32> to vector<1x16x128xf32>
    tpu.vector_store %arg5[%c0_19, %c0_20, %c0_21], %34 {strides = array<i32>} : memref<1x16x128xf32, #tpu.memory_space<vmem>>, vector<1x16x128xf32>,
    return
  }
  func.func @transform_0(%arg0: i32, %arg1: i32) -> (i32, i32, i32, i32) {
    %c0_i32 = arith.constant 0 : i32
    %c0_i32_0 = arith.constant 0 : i32
    %c0_i32_1 = arith.constant 0 : i32
    return %arg0, %arg1, %c0_i32, %c0_i32_0 : i32, i32, i32, i32
  }
  func.func @transform_1(%arg0: i32, %arg1: i32) -> (i32, i32, i32) {
    %c0_i32 = arith.constant 0 : i32
    %c0_i32_0 = arith.constant 0 : i32
    %c0_i32_1 = arith.constant 0 : i32
    %c0_i32_2 = arith.constant 0 : i32
    return %c0_i32, %c0_i32_0, %c0_i32_1 : i32, i32, i32
  }
  func.func @transform_2(%arg0: i32, %arg1: i32) -> (i32, i32) {
    %c0_i32 = arith.constant 0 : i32
    %c0_i32_0 = arith.constant 0 : i32
    %c0_i32_1 = arith.constant 0 : i32
    return %c0_i32, %c0_i32_0 : i32, i32
  }
  func.func @transform_3(%arg0: i32, %arg1: i32) -> (i32, i32, i32) {
    %c0_i32 = arith.constant 0 : i32
    %c0_i32_0 = arith.constant 0 : i32
    return %arg0, %c0_i32, %arg1 : i32, i32, i32
  }
}

</mosaic_0001>

<bundles_post_ra>
// kernel: tpu_custom_call.1
= control target key start
LH: loop header
LB: loop body
LE: loop exit
PB: predicated region body
PF: predicated region fallthrough
CT: control target
= control target key end

     0   :  { %8 = vsyncpa [#allocation3], 0  ;;  %s7144_s0 = inlined_call_operand.vmem [shape: f32[2,1,16,131], index: 0, kind: input, shape index: {}]   ;;  %s7145_s1 = inlined_call_operand.vmem [shape: f32[4,80,16], index: 1, kind: input, shape index: {}]   ;;  %s7146_s2 = inlined_call_operand.vmem [shape: f32[16,40], index: 2, kind: input, shape index: {}]   ;;  %s7147_s3 = inlined_call_operand.hbm [shape: f32[2,16,128], index: 3, kind: output, shape index: {}]  }
   0x1   :  { %10 = vsyncpa [#allocation3 + $0x1], 0  ;;  %s5991_s12 = smov 0   ;;  %s5993_s13 = smov 0  }
   0x2   :  { %s5995_s14 = smov 0   ;;  %s5997_s15 = smov 0  }
   0x3   :  { %s5999_s16 = smov 0   ;;  %s6001_s17 = smov 0  }
   0x4 LB: > { %s4516_s18 = sadd.s32 4294967295, %s5963_s17   ;;  %s4517_s19 = sadd.s32 4294967294, %s5963_s17   ;;  %s5963_s17 = sphi %s6001_s17, %s16_s17   ;;  %s5959_s16 = sphi %s5999_s16, %s7358_s16   ;;  %s5955_s15 = sphi %s5997_s15, %s7357_s15   ;;  %s5951_s14 = sphi %s5995_s14, %s7356_s14   ;;  %s5947_s13 = sphi %s5993_s13, %s7355_s13   ;;  %s5943_s12 = sphi %s5991_s12, %s7354_s12  }
   0x5   : > { %s28_s20 = sadd.s32 1, %s5959_s16  ;;  %s107_s21 = sadd.s32 1, %s5951_s14 }
   0x6   : > { %p30_p0 = scmp.ge.s32.totalorder %s28_s20, 2  ;;  %p117_p1 = scmp.ne.s32.totalorder %s5951_s14, %s5947_s13 }
   0x7   : > { %p118_p2 = scmp.eq.s32.totalorder %s4516_s18, 1  ;;  %p123_p3 = scmp.ne.s32.totalorder %s5947_s13, %s5943_s12 }
   0x8   : > { %s7360_s20 = smov (%p30_p0, %s28_s20), 0  ;;  %p124_p5 = scmp.eq.s32.totalorder %s4517_s19, 1 }
   0x9   : > { %p6031_p4 = por %p118_p2, %p117_p1  ;;  %s102_s23 = ssub.s32 %s5959_s16, %s7360_s20 }
   0xa   : > { %p4520_p6 = scmp.ge.s32.totalorder %s5963_s17, 1  ;;  %p105_p7 = scmp.eq.s32.totalorder %s102_s23, 0 }
   0xb   : > { %p6038_p8 = por %p124_p5, %p123_p3  ;;  %p160_p9 = scmp.lt.s32.totalorder %s5963_s17, 3 }
   0xc   : > { %s6044_s25 = scalar_select %p105_p7, %s5951_s14, %s107_s21  }
   0xd   : > { %p161_p10 = pnand %p4520_p6, %p160_p9 }
   0xf   : > { %164 = sbr.rel (%p161_p10) target bundleno = 931 (0x3a3), region = 32 }
  0x16   : > { %p188_p11 = scmp.lt.s32.totalorder %s5955_s15, 1  ;;  %v201_v0 = vld [vmem:[%s7145_s1] sm:$0xff]  ;;  %vm239_vm0 = vcmask 130048   ;;  %s5965_s6 = smov 126   ;;  %v4524_v9 = vld [vmem:[%s7145_s1 + $0x50] sm:$0xff]  ;;  %v202_v12 = vld [vmem:[%s7145_s1 + $0x8] sm:$0xff] }
  0x17   : > { %v6051_v1 = vsel %vm239_vm0, %v201_v0, 0  ;;  %v241_v13 = vsel %vm239_vm0, %v4524_v9, 0  ;;  %v203_v16 = vld [vmem:[%s7145_s1 + $0x10] sm:$0xff]  ;;  %v6086_v19 = vsel %vm239_vm0, %v202_v12, 0  ;;  %v204_v22 = vld [vmem:[%s7145_s1 + $0x18] sm:$0xff]  ;;  %s5966_s23 = smov 127  }
  0x18   : > { %7230 = vst [vmem:[#allocation5_spill] sm:$0xff] %v6051_v1  ;;  %s189_s28 = scalar_select %p188_p11, %s5955_s15, 1  ;;  %v6055_v2 = vand.u32 4294901760, %v6051_v1  ;;  %v6077_v17 = vand.u32 4294901760, %v241_v13  ;;  %7235 = vst [vmem:[#allocation10_spill] sm:$0xff] %v6086_v19  ;;  %v6091_v21 = vsel %vm239_vm0, %v203_v16, 0 }
  0x19   : > { %7237 = vst [vmem:[#allocation12_spill] sm:$0xff] %v6091_v21  ;;  %v6101_v24 = vand.u32 4294901760, %v6086_v19  ;;  %v6106_v26 = vand.u32 4294901760, %v6091_v21  ;;  %v6109_v27 = vsel %vm239_vm0, %v204_v22, 0  ;;  %v4534_v29 = vld [vmem:[%s7145_s1 + $0xa0] sm:$0xff]  ;;  %v206_v36 = vld [vmem:[%s7145_s1 + $0x28] sm:$0xff] }
  0x1a   : > { %7231 = vst [vmem:[#allocation6_spill] sm:$0xff] %v6055_v2  ;;  %s4559_s29 = sshll.u32 %s189_s28, 5  ;;  %5085 = vmatprep.mubr.f32.mxu0 %v6055_v2  ;;  %v6097_v23 = vsub.f32 %v241_v13, %v6077_v17  ;;  %7240 = vst [vmem:[#allocation15_spill] sm:$0xff] %v6109_v27  ;;  %v6120_v30 = vand.u32 4294901760, %v6109_v27  ;;  %v2017_v32 = vsel %vm239_vm0, %v4534_v29, 0  ;;  %s5967_s28 = smov 125  }
  0x1b   : > { %s196_s5 = scalar_lea.vmem %s7144_s0, %s4559_s29  ;;  %7238 = vst [vmem:[#allocation13_spill] sm:$0xff] %v6101_v24  ;;  %7239 = vst [vmem:[#allocation14_spill] sm:$0xff] %v6106_v26  ;;  %v205_v33 = vld [vmem:[%s7145_s1 + $0x20] sm:$0xff]  ;;  %v6130_v34 = vand.u32 4294901760, %v2017_v32  ;;  %v207_v37 = vld [vmem:[%s7145_s1 + $0x30] sm:$0xff]  ;;  %v6147_v39 = vsel %vm239_vm0, %v206_v36, 0 }
  0x1c   : > { %v199_v3 = vld [vmem:[%s196_s5 + $0x10] sm:$0xff]  ;;  %v197_v4 = vld [vmem:[%s196_s5] sm:$0xff]  ;;  %v200_v7 = vld [vmem:[%s196_s5 + $0x18] sm:$0xff]  ;;  %v7150_v25 = vand.u32 4294901760, %v6097_v23  ;;  %7241 = vst [vmem:[#allocation16_spill] sm:$0xff] %v6120_v30  ;;  %v6133_v35 = vsel %vm239_vm0, %v205_v33, 0 }
  0x1d   : > { %2007 = vrot.lane.b32.xlu1 %v199_v3, %s5965_s6  ;;  %v1150_v5 = vand.u32 4294901760, %v199_v3  ;;  %2003 = vrot.lane.b32.xlu0 %v197_v4, %s5965_s6  ;;  %v1147_v6 = vand.u32 4294901760, %v197_v4  ;;  %v198_v8 = vld [vmem:[%s196_s5 + $0x8] sm:$0xff]  ;;  %7242 = vst [vmem:[#allocation17_spill] sm:$0xff] %v6133_v35  ;;  %v6144_v38 = vand.u32 4294901760, %v6133_v35  ;;  %7244 = vst [vmem:[#allocation19_spill] sm:$0xff] %v6147_v39  ;;  %v6150_v40 = vsub.f32 %v2017_v32, %v6130_v34 }
  0x1e   : > { %v340_v28 = vsub.f32 %v6097_v23, %v7150_v25  ;;  %v6153_v41 = vsel %vm239_vm0, %v207_v37, 0  ;;  %v208_v42 = vld [vmem:[%s7145_s1 + $0x38] sm:$0xff]  ;;  %v209_v43 = vld [vmem:[%s7145_s1 + $0x40] sm:$0xff]  ;;  %v6163_v44 = vand.u32 4294901760, %v6147_v39  ;;  %v210_v49 = vld [vmem:[%s7145_s1 + $0x48] sm:$0xff]  ;;  %vm2011_vm1 = vcmask 1031168  }
  0x1f   : > { %v6064_v10 = vsub.f32 %v199_v3, %v1150_v5  ;;  %v6066_v11 = vsub.f32 %v197_v4, %v1147_v6  ;;  %v6088_v20 = vpack.c.bf16 %v1150_v5, %v1147_v6  ;;  %7243 = vst [vmem:[#allocation18_spill] sm:$0xff] %v6144_v38  ;;  %7245 = vst [vmem:[#allocation20_spill] sm:$0xff] %v6153_v41  ;;  %v6167_v45 = vand.u32 4294901760, %v6153_v41  ;;  %v4535_v56 = vld [vmem:[%s7145_s1 + $0xa8] sm:$0xff]  ;;  %v4536_v57 = vld [vmem:[%s7145_s1 + $0xb0] sm:$0xff]  ;;  %s4560_s10 = sshll.u32 %s5955_s15, 8 }
  0x20   : > { %v341_v31 = vand.u32 4294901760, %v340_v28  ;;  %7246 = vst [vmem:[#allocation21_spill] sm:$0xff] %v6163_v44  ;;  %v6170_v46 = vsel %vm239_vm0, %v208_v42, 0  ;;  %v7155_v47 = vand.u32 4294901760, %v6150_v40  ;;  %v6174_v48 = vsel %vm239_vm0, %v209_v43, 0  ;;  %v4537_v58 = vld [vmem:[%s7145_s1 + $0xb8] sm:$0xff]  ;;  %s7096_s19 = scalar_lea.hbm %s7147_s3, %s4560_s10 }
  0x21   : > { %7232 = vst [vmem:[#allocation7_spill] sm:$0xff] %v6064_v10  ;;  %7233 = vst [vmem:[#allocation8_spill] sm:$0xff] %v6066_v11  ;;  %2009 = vrot.lane.b32.xlu1 %v200_v7, %s5965_s6  ;;  %2005 = vrot.lane.b32.xlu0 %v198_v8, %s5965_s6  ;;  %v7149_v14 = vand.u32 4294901760, %v6066_v11  ;;  %v7148_v15 = vand.u32 4294901760, %v6064_v10  ;;  %v6181_v50 = vand.u32 4294901760, %v6170_v46  ;;  %v6185_v51 = vand.u32 4294901760, %v6174_v48 }
  0x22   : > { %7236 = vst [vmem:[#allocation11_spill] sm:$0xff] %v6088_v20  ;;  %4895 = vmatprep.mubr.f32.mxu1 %v341_v31  ;;  %7247 = vst [vmem:[#allocation22_spill] sm:$0xff] %v6167_v45  ;;  %v6188_v52 = vsel %vm239_vm0, %v210_v49, 0  ;;  %v2116_v53 = vsub.f32 %v6150_v40, %v7155_v47  ;;  %v4538_v59 = vld [vmem:[%s7145_s1 + $0xc0] sm:$0xff]  ;;  %v4525_v60 = vld [vmem:[%s7145_s1 + $0x58] sm:$0xff]  ;;  %v2020_v62 = vsel %vm239_vm0, %v4535_v56, 0 }
  0x23   : > { %v6083_v18 = vpack.c.bf16 %v7148_v15, %v7149_v14  ;;  %7248 = vst [vmem:[#allocation23_spill] sm:$0xff] %v6170_v46  ;;  %7249 = vst [vmem:[#allocation24_spill] sm:$0xff] %v6174_v48  ;;  %v6195_v54 = vand.u32 4294901760, %v6188_v52  ;;  %v4539_v61 = vld [vmem:[%s7145_s1 + $0xc8] sm:$0xff]  ;;  %v2023_v63 = vsel %vm239_vm0, %v4536_v57, 0  ;;  %v2026_v0 = vsel %vm239_vm0, %v4537_v58, 0 }
  0x24   : > { %7250 = vst [vmem:[#allocation25_spill] sm:$0xff] %v6181_v50  ;;  %7251 = vst [vmem:[#allocation26_spill] sm:$0xff] %v6185_v51  ;;  %v2117_v55 = vand.u32 4294901760, %v2116_v53  ;;  %v2032_v5 = vsel %vm239_vm0, %v4539_v61, 0  ;;  %v6223_v6 = vand.u32 4294901760, %v2020_v62  ;;  %v4526_v9 = vld [vmem:[%s7145_s1 + $0x60] sm:$0xff] }
  0x25   : > { %7234 = vst [vmem:[#allocation9_spill] sm:$0xff] %v6083_v18  ;;  %228 = vrot.lane.b32.xlu1 %v198_v8, %s5966_s23  ;;  %226 = vrot.lane.b32.xlu0 %v197_v4, %s5966_s23  ;;  %7252 = vst [vmem:[#allocation27_spill] sm:$0xff] %v6188_v52  ;;  %v6236_v16 = vand.u32 4294901760, %v2032_v5  ;;  %v4540_v22 = vld [vmem:[%s7145_s1 + $0xd0] sm:$0xff]  ;;  %v247_v31 = vsel %vm239_vm0, %v4526_v9, 0  ;;  %v4527_v43 = vld [vmem:[%s7145_s1 + $0x68] sm:$0xff] }
  0x26   : > { %5466 = vmatprep.subr.bf16.mxu0 %v6083_v18  ;;  %7253 = vst [vmem:[#allocation28_spill] sm:$0xff] %v6195_v54  ;;  %v6242_v28 = vsub.f32 %v2020_v62, %v6223_v6  ;;  %v2035_v42 = vsel %vm239_vm0, %v4540_v22, 0  ;;  %v6264_v49 = vand.u32 4294901760, %v247_v31  ;;  %v4541_v53 = vld [vmem:[%s7145_s1 + $0xd8] sm:$0xff]  ;;  %vm234_vm2 = vcmask 1039360   ;;  %v4531_v39 = vld [vmem:[%s7145_s1 + $0x88] sm:$0xff] }
  0x27   : > { %5468 = vmatpush3.bf16.msra.mxu0 %v6083_v18  ;;  %v6258_v37 = vsub.f32 %v2032_v5, %v6236_v16  ;;  %v6272_v58 = vand.u32 4294901760, %v2035_v42  ;;  %vm2921_vm3 = vcmask 1022976   ;;  %vm3864_vm4 = vcmask 326656   ;;  %s185_s6 = sand.u32 1, %s5947_s13   ;;  %s5968_s15 = smov [#allocation2]  }
  0x28   : > { %5470 = vmatprep.subr.bf16.mxu0 %v6088_v20  ;;  %s4521_s7 = sshll.u32 %s185_s6, 4  ;;  %s7098_s21 = scalar_lea.sflag [#allocation3], %s185_s6 }
  0x29   : > { %232 = vrot.lane.b32.xlu1 %v200_v7, %s5966_s23  ;;  %230 = vrot.lane.b32.xlu0 %v199_v3, %s5966_s23  ;;  %7254 = vst [vmem:[#allocation29_spill] sm:$0xff] %v6258_v37  ;;  %v7159_v62 = vand.u32 4294901760, %v6258_v37  ;;  %s187_s8 = scalar_lea.vmem [#allocation2], %s4521_s7  ;;  %s5889_s26 = sshll.u32 %s5968_s15, 4  ;;  %s5890_s26 = int_to_ptr.vmem [resolvable:$false] %s5889_s26 }
  0x2a   : > { %5086 = vmatmul.mubr.f32.vlgmr.msra.gmra.mrb[0].mxu0 %v6101_v24  ;;  %s4435_s9 = sshll.u32 %s187_s8, 4  ;;  %s5891_s27 = scalar_lea.vmem %s5890_s26, 512  ;;  %s7091_s9 = int_to_ptr.vmem [resolvable:$true] %s4435_s9 }
  0x2b   : > { %5088 = vmatprep.mubr.f32.mxu0 %v6106_v26  ;;  %5472 = vmatpush3.bf16.msra.mxu0 %v6088_v20  ;;  %s5885_s23 = scalar_lea.vmem %s7091_s9, 256  ;;  %p5892_p1 = scmp.lt.s32.totalorder %s7091_s9, %s5890_s26 }
  0x2c   : > { %p5886_p12 = scmp.ne.s32.totalorder %s7091_s9, %s5885_s23  ;;  %p5893_p2 = scmp.lt.s32.totalorder %s5891_s27, %s5885_s23 }
  0x2d   : > { %2915 = vrot.lane.b32.xlu1 %v198_v8, %s5967_s28  ;;  %2913 = vrot.lane.b32.xlu0 %v197_v4, %s5967_s28  ;;  %v244_v4 = vsel %vm239_vm0, %v4525_v60, 0  ;;  %v6227_v8 = vand.u32 4294901760, %v2026_v0 }
  0x2e   : > { %5089 = vmatmul.mubr.f32.gmra.mrb[2].mxu0 %v6120_v30  ;;  %v6234_v13 = vand.u32 4294901760, %v244_v4  ;;  %p5887_p13 = pnand %p5886_p12, %p6031_p4  ;;  %p5894_p3 = por %p5893_p2, %p5892_p1 }
  0x2f   : > { %5104 = vmatprep.mubr.f32.mxu0 %v6055_v2  ;;  %v6249_v32 = vsub.f32 %v2026_v0, %v6227_v8  ;;  %v6280_v0 = vsub.f32 %v247_v31, %v6264_v49  ;;  %v6303_v31 = vsub.f32 %v2035_v42, %v6272_v58  ;;  %v6323_v42 = vsub.f32 %v6258_v37, %v7159_v62 }
  0x30   : > { %v6255_v36 = vsub.f32 %v244_v4, %v6234_v13  ;;  %p5888_p0 = pneg %p5887_p13 }
  0x31   : > { %2919 = vrot.lane.b32.xlu1 %v200_v7, %s5967_s28  ;;  %2917 = vrot.lane.b32.xlu0 %v199_v3, %s5967_s28  ;;  %v2029_v3 = vsel %vm239_vm0, %v4538_v59, 0  ;;  %v6225_v7 = vand.u32 4294901760, %v2023_v63  ;;  %v7151_v57 = vand.u32 4294901760, %v6249_v32  ;;  %v250_v59 = vsel %vm239_vm0, %v4527_v43, 0  ;;  %7255 = vst [vmem:[#allocation30_spill] sm:$0xff] %v6280_v0  ;;  %7256 = vst [vmem:[#allocation31_spill] sm:$0xff] %v6303_v31 }
  0x32   : > { %5105 = vmatmul.mubr.f32.vlgmr.msra.gmra.mrb[0].mxu0 %v6101_v24  ;;  %v6232_v12 = vand.u32 4294901760, %v2029_v3  ;;  %v7156_v61 = vand.u32 4294901760, %v6255_v36  ;;  %v6295_v9 = vand.u32 4294901760, %v250_v59  ;;  %v7259_v46 = vand.u32 4294901760, %v6280_v0  ;;  %p5895_p5 = pnand %p5894_p3, %p5888_p0 }
  0x33   : > { %5107 = vmatprep.mubr.f32.mxu0 %v6106_v26  ;;  %v6245_v29 = vsub.f32 %v2023_v63, %v6225_v7  ;;  %v2038_v63 = vsel %vm239_vm0, %v4541_v53, 0  ;;  %v6300_v22 = vsub.f32 %v6249_v32, %v7151_v57  ;;  %v4542_v53 = vld [vmem:[%s7145_s1 + $0xe0] sm:$0xff] }
  0x34   : > { %v6252_v33 = vsub.f32 %v2029_v3, %v6232_v12  ;;  %v4528_v3 = vld [vmem:[%s7145_s1 + $0x70] sm:$0xff]  ;;  %v6305_v43 = vand.u32 4294901760, %v2038_v63  ;;  %v6318_v57 = vsub.f32 %v6255_v36, %v7156_v61  ;;  %v6333_v18 = vsub.f32 %v250_v59, %v6295_v9  ;;  %v4530_v59 = vld [vmem:[%s7145_s1 + $0x80] sm:$0xff] }
  0x35   : > { %v7152_v56 = vand.u32 4294901760, %v6245_v29  ;;  %v2041_v62 = vsel %vm239_vm0, %v4542_v53, 0 }
  0x36   : > { %5108 = vmatmul.mubr.f32.gmra.mrb[2].mxu0 %v6120_v30  ;;  %v7154_v60 = vand.u32 4294901760, %v6252_v33  ;;  %7257 = vst [vmem:[#allocation32_spill] sm:$0xff] %v6333_v18  ;;  %v6357_v41 = vand.u32 4294901760, %v2041_v62 }
  0x37   : > { %5110 = vmatprep.mubr.f32.mxu0 %v6144_v38  ;;  %v6293_v5 = vsub.f32 %v6245_v29, %v7152_v56  ;;  %v253_v56 = vsel %vm239_vm0, %v4528_v3, 0  ;;  %v259_v38 = vsel %vm239_vm0, %v4530_v59, 0 }
  0x38   : > { %v6313_v25 = vsub.f32 %v6252_v33, %v7154_v60  ;;  %v4529_v60 = vld [vmem:[%s7145_s1 + $0x78] sm:$0xff]  ;;  %v6388_v27 = vsub.f32 %v2041_v62, %v6357_v41  ;;  %v7263_v62 = vand.u32 4294901760, %v6333_v18 }
  0x39   : > { %v256_v52 = vsel %vm239_vm0, %v4529_v60, 0 }
  0x3a   : > { %5111 = vmatmul.mubr.f32.gmra.mrb[4].mxu0 %v6163_v44  ;;  %7262 = vst [vmem:[#allocation35_spill] sm:$0xff] %v6388_v27  ;;  %v6403_v59 = vsub.f32 %v6333_v18, %v7263_v62 }
  0x3b   : > { %5113 = vmatprep.mubr.f32.mxu0 %v6167_v45 }
  0x3e   : > { %5114 = vmatmul.mubr.f32.gmra.mrb[6].mxu0 %v6181_v50  ;;  %v6355_v50 = vsub.f32 %v6280_v0, %v7259_v46 }
  0x3f   : > { %5116 = vmatprep.mubr.f32.mxu0 %v6185_v51 }
  0x42   : > { %5117 = vmatmul.mubr.f32.gmra.mrb[8].mxu0 %v6195_v54  ;;  %v6339_v54 = vsub.f32 %v2038_v63, %v6305_v43 }
  0x43   : > { %5123 = vmatprep.mubr.f32.mxu0 %v2117_v55  ;;  %v7153_v55 = vand.u32 4294901760, %v6242_v28 }
  0x44   : > { %7258 = vst [vmem:[#allocation33_spill] sm:$0xff] %v6339_v54 }
  0x45   : > { %v6288_v4 = vsub.f32 %v6242_v28, %v7153_v55  ;;  %v6341_v55 = vand.u32 4294901760, %v253_v56 }
  0x47   : > { %v2127_v47 = vand.u32 4294901760, %v6288_v4  ;;  %v4543_v4 = vld [vmem:[%s7145_s1 + $0xe8] sm:$0xff] }
  0x48   : > { %v2044_v60 = vsel %vm239_vm0, %v4543_v4, 0 }
  0x49   : > { %v6390_v30 = vand.u32 4294901760, %v2044_v60 }
  0x4b   : > { %v6426_v2 = vsub.f32 %v2044_v60, %v6390_v30 }
  0x8f   : > { %v2008_v15 = vpop.permute.xlu1 %2007  ;;  %v2004_v14 = vpop.permute.xlu0 %2003 }
  0x93   : > { %v2010_v48 = vpop.permute.xlu1 %2009  ;;  %v2006_v61 = vpop.permute.xlu0 %2005 }
  0x94   : > { %v2013_v3 = vsel %vm2011_vm1, %v2008_v15, %v2010_v48  ;;  %v2012_v63 = vsel %vm2011_vm1, %v2004_v14, %v2006_v61  ;;  %v7260_v15 = vand.u32 4294901760, %v6303_v31  ;;  %v6371_v48 = vsub.f32 %v253_v56, %v6341_v55 }
  0x95   : > { %v2050_v51 = vand.u32 4294901760, %v2013_v3  ;;  %v2047_v45 = vand.u32 4294901760, %v2012_v63  ;;  %v6373_v61 = vand.u32 4294901760, %v256_v52 }
  0x96   : > { %v6367_v14 = vsub.f32 %v6303_v31, %v7260_v15  ;;  %7261 = vst [vmem:[#allocation34_spill] sm:$0xff] %v6371_v48 }
  0x97   : > { %v6378_v44 = vsub.f32 %v2013_v3, %v2050_v51  ;;  %v6380_v53 = vpack.c.bf16 %v2050_v51, %v2047_v45  ;;  %v6382_v4 = vsub.f32 %v2012_v63, %v2047_v45  ;;  %v229_v35 = vpop.permute.xlu1 %228  ;;  %v227_v15 = vpop.permute.xlu0 %226  ;;  %v4532_v51 = vld [vmem:[%s7145_s1 + $0x90] sm:$0xff]  ;;  %v6407_v56 = vsub.f32 %v256_v52, %v6373_v61  ;;  %v4533_v52 = vld [vmem:[%s7145_s1 + $0x98] sm:$0xff] }
  0x98   : > { %v235_v46 = vsel %vm234_vm2, %v227_v15, %v229_v35  ;;  %v262_v35 = vsel %vm239_vm0, %v4531_v39, 0  ;;  %v6409_v45 = vand.u32 4294901760, %v259_v38  ;;  %v265_v1 = vsel %vm239_vm0, %v4532_v51, 0 }
  0x99   : > { %v271_v63 = vand.u32 4294901760, %v235_v46  ;;  %5474 = vmatprep.subr.bf16.mxu0 %v6380_v53  ;;  %v7264_v39 = vand.u32 4294901760, %v6382_v4  ;;  %v7265_v24 = vand.u32 4294901760, %v6378_v44  ;;  %v6428_v10 = vand.u32 4294901760, %v262_v35 }
  0x9a   : > { %5476 = vmatpush3.bf16.msra.mxu0 %v6380_v53  ;;  %v7266_v51 = vand.u32 4294901760, %v6293_v5  ;;  %v2177_v18 = vand.u32 4294901760, %v6367_v14  ;;  %v268_v60 = vsel %vm239_vm0, %v4533_v52, 0  ;;  %v7268_v14 = vand.u32 4294901760, %v6339_v54 }
  0x9b   : > { %v6411_v3 = vsub.f32 %v235_v46, %v271_v63  ;;  %v233_v21 = vpop.permute.xlu1 %232  ;;  %v231_v26 = vpop.permute.xlu0 %230  ;;  %v2217_v19 = vsub.f32 %v6382_v4, %v7264_v39  ;;  %v2224_v62 = vsub.f32 %v6378_v44, %v7265_v24  ;;  %v7273_v0 = vand.u32 4294901760, %v6407_v56 }
  0x9c   : > { %v236_v15 = vsel %vm234_vm2, %v231_v26, %v233_v21  ;;  %v6435_v21 = vsub.f32 %v259_v38, %v6409_v45  ;;  %v6437_v26 = vand.u32 4294901760, %v265_v1  ;;  %v2186_v38 = vsub.f32 %v6339_v54, %v7268_v14 }
  0x9d   : > { %v274_v11 = vand.u32 4294901760, %v236_v15  ;;  %5124 = vmatmul.mubr.f32.vlgmr.msra.gmra.mrb[0].mxu0 %v2127_v47  ;;  %v2218_v24 = vand.u32 4294901760, %v2217_v19  ;;  %v2225_v20 = vand.u32 4294901760, %v2224_v62  ;;  %v7267_v19 = vand.u32 4294901760, %v6411_v3 }
  0x9e   : > { %5126 = vmatprep.mubr.f32.mxu0 %v7266_v51  ;;  %v6465_v14 = vand.u32 4294901760, %v268_v60  ;;  %v2187_v54 = vand.u32 4294901760, %v2186_v38 }
  0x9f   : > { %v6440_v46 = vpack.c.bf16 %v274_v11, %v271_v63  ;;  %v6442_v31 = vsub.f32 %v236_v15, %v274_v11  ;;  %v5477_v39 = vpack.c.bf16 %v2225_v20, %v2218_v24  ;;  %v441_v47 = vsub.f32 %v6411_v3, %v7267_v19  ;;  %v2916_v5 = vpop.permute.xlu1 %2915  ;;  %v2914_v62 = vpop.permute.xlu0 %2913 }
  0xa0   : > { %v6453_v63 = vsub.f32 %v262_v35, %v6428_v10  ;;  %v7269_v20 = vand.u32 4294901760, %v6300_v22  ;;  %v7270_v15 = vand.u32 4294901760, %v6371_v48  ;;  %v7271_v24 = vand.u32 4294901760, %v6388_v27 }
  0xa1   : > { %v7208_v11 = vand.u32 4294901760, %v6442_v31  ;;  %5426 = vmatprep.subr.bf16.mxu1 %v6440_v46  ;;  %5478 = vmatprep.subr.bf16.mxu0 %v5477_v39  ;;  %v5481_v35 = vpack.c.bf16 %v6378_v44, %v6382_v4  ;;  %v6472_v22 = vsub.f32 %v265_v1, %v6437_v26  ;;  %v390_v1 = vsub.f32 %v6407_v56, %v7273_v0 }
  0xa2   : > { %5127 = vmatmul.mubr.f32.gmra.mrb[2].mxu0 %v7269_v20  ;;  %v380_v52 = vsub.f32 %v6371_v48, %v7270_v15  ;;  %v2196_v19 = vsub.f32 %v6388_v27, %v7271_v24  ;;  %5428 = vmatpush3.bf16.msra.mxu1 %v6440_v46  ;;  %v7272_v20 = vand.u32 4294901760, %v6313_v25  ;;  %v371_v15 = vand.u32 4294901760, %v6403_v59 }
  0xa3   : > { %5480 = vmatpush3.bf16.msra.mxu0 %v5477_v39  ;;  %v442_v24 = vand.u32 4294901760, %v441_v47  ;;  %v448_v51 = vsub.f32 %v6442_v31, %v7208_v11  ;;  %v2920_v27 = vpop.permute.xlu1 %2919  ;;  %v2918_v48 = vpop.permute.xlu0 %2917  ;;  %v7274_v39 = vand.u32 4294901760, %v6426_v2  ;;  %v7275_v59 = vand.u32 4294901760, %v6318_v57 }
  0xa4   : > { %5129 = vmatprep.mubr.f32.mxu0 %v7272_v20  ;;  %5482 = vmatprep.subr.bf16.mxu0 %v5481_v35  ;;  %v7276_v47 = vand.u32 4294901760, %v6323_v42  ;;  %v6492_v11 = vsub.f32 %v268_v60, %v6465_v14  ;;  %v6495_v37 = vsel %vm2921_vm3, %v2914_v62, %v2916_v5  ;;  %v6498_v0 = vsel %vm2921_vm3, %v2918_v48, %v2920_v27 }
  0xa5   : > { %v2206_v25 = vsub.f32 %v6426_v2, %v7274_v39  ;;  %4896 = vmatmul.mubr.f32.vlgmr.msra.gmra.mrb[0].mxu1 %v7275_v59  ;;  %v449_v38 = vand.u32 4294901760, %v448_v51  ;;  %v7277_v39 = vand.u32 4294901760, %v6355_v50  ;;  %v381_v20 = vand.u32 4294901760, %v380_v52 }
  0xa6   : > { %5130 = vmatmul.mubr.f32.gmra.mrb[4].mxu0 %v7276_v47  ;;  %v2197_v57 = vand.u32 4294901760, %v2196_v19  ;;  %v7278_v59 = vand.u32 4294901760, %v6435_v21  ;;  %v419_v60 = vand.u32 4294901760, %v6472_v22  ;;  %v2957_v51 = vand.u32 4294901760, %v6495_v37 }
  0xa7   : > { %4898 = vmatprep.mubr.f32.mxu1 %v7277_v39  ;;  %5132 = vmatprep.mubr.f32.mxu0 %v2177_v18  ;;  %v5429_v47 = vpack.c.bf16 %v449_v38, %v442_v24  ;;  %v2960_v5 = vand.u32 4294901760, %v6498_v0  ;;  %v391_v27 = vand.u32 4294901760, %v390_v1  ;;  %v2207_v48 = vand.u32 4294901760, %v2206_v25 }
  0xa8   : > { %v400_v42 = vsub.f32 %v6435_v21, %v7278_v59  ;;  %v7279_v50 = vand.u32 4294901760, %v6453_v63  ;;  %v429_v62 = vand.u32 4294901760, %v6492_v11  ;;  %v420_v19 = vsub.f32 %v6472_v22, %v419_v60 }
  0xa9   : > { %4899 = vmatmul.mubr.f32.gmra.mrb[2].mxu1 %v371_v15  ;;  %5430 = vmatprep.subr.bf16.mxu1 %v5429_v47  ;;  %v5433_v15 = vpack.c.bf16 %v6442_v31, %v6411_v3  ;;  %v6525_v24 = vsub.f32 %v6498_v0, %v2960_v5  ;;  %v4547_v0 = vld [vmem:[%s7145_s1 + $0x108] sm:$0xff] }
  0xaa   : > { %5133 = vmatmul.mubr.f32.gmra.mrb[6].mxu0 %v2187_v54  ;;  %v410_v18 = vsub.f32 %v6453_v63, %v7279_v50  ;;  %4901 = vmatprep.mubr.f32.mxu1 %v381_v20  ;;  %v401_v52 = vand.u32 4294901760, %v400_v42  ;;  %v6520_v54 = vsub.f32 %v6495_v37, %v2957_v51  ;;  %v430_v25 = vsub.f32 %v6492_v11, %v429_v62  ;;  %v7285_v50 = vld [vmem:[#allocation30_spill] sm:$0xff] }
  0xab   : > { %5135 = vmatprep.mubr.f32.mxu0 %v2197_v57  ;;  %5432 = vmatpush3.bf16.msra.mxu1 %v5429_v47  ;;  %v421_v20 = vand.u32 4294901760, %v420_v19  ;;  %v3133_v39 = vand.u32 4294901760, %v6525_v24  ;;  %v7281_v42 = vand.u32 4294901760, %v6378_v44  ;;  %v7283_v44 = vand.u32 4294901760, %v6411_v3  ;;  %v7288_v19 = vld [vmem:[#allocation33_spill] sm:$0xff] }
  0xac   : > { %v411_v1 = vand.u32 4294901760, %v410_v18  ;;  %5434 = vmatprep.subr.bf16.mxu1 %v5433_v15  ;;  %v3126_v38 = vand.u32 4294901760, %v6520_v54  ;;  %v431_v57 = vand.u32 4294901760, %v430_v25  ;;  %v7286_v18 = vld [vmem:[#allocation31_spill] sm:$0xff]  ;;  %v7292_v3 = vand.u32 4294901760, %v6242_v28 }
  0xad   : > { %4902 = vmatmul.mubr.f32.gmra.mrb[4].mxu1 %v391_v27  ;;  %v7284_v27 = vand.u32 4294901760, %v6442_v31  ;;  %v7291_v31 = vand.u32 4294901760, %v6150_v40  ;;  %v7293_v25 = vand.u32 4294901760, %v6245_v29 }
  0xae   : > { %5136 = vmatmul.mubr.f32.gmra.mrb[8].mxu0 %v2207_v48  ;;  %4904 = vmatprep.mubr.f32.mxu1 %v401_v52  ;;  %v6538_v59 = vpack.c.bf16 %v3133_v39, %v3126_v38  ;;  %v7287_v52 = vld [vmem:[#allocation32_spill] sm:$0xff]  ;;  %v3127_v37 = vsub.f32 %v6520_v54, %v3126_v38  ;;  %v2936_v38 = vsel %vm239_vm0, %v4547_v0, 0 }
  0xaf   : > { %5142 = vmatprep.mubr.f32.mxu0 %v6130_v34  ;;  %v5441_v48 = vpack.c.bf16 %v7284_v27, %v7283_v44  ;;  %v7307_v44 = vand.u32 4294901760, %v6435_v21  ;;  %v6631_v27 = vpack.c.bf16 %v2960_v5, %v2957_v51 }
  0xb1   : > { %4905 = vmatmul.mubr.f32.gmra.mrb[6].mxu1 %v411_v1  ;;  %v7290_v1 = vld [vmem:[#allocation35_spill] sm:$0xff] }
  0xb2   : > { %5143 = vmatmul.mubr.f32.vlgmr.msra.gmra.mrb[0].mxu0 %v6223_v6  ;;  %4907 = vmatprep.mubr.f32.mxu1 %v421_v20  ;;  %v7294_v20 = vand.u32 4294901760, %v6249_v32 }
  0xb3   : > { %5484 = vmatpush3.bf16.msra.mxu0 %v5481_v35  ;;  %5145 = vmatprep.mubr.f32.mxu0 %v6225_v7  ;;  %v7280_v35 = vand.u32 4294901760, %v6382_v4  ;;  %v7282_v4 = vld [vmem:[#allocation29_spill] sm:$0xff] }
  0xb4   : > { %5486 = vmatprep.subr.bf16.mxu0 %v6380_v53 }
  0xb5   : > { %4908 = vmatmul.mubr.f32.gmra.mrb[8].mxu1 %v431_v57  ;;  %v5489_v47 = vpack.c.bf16 %v7281_v42, %v7280_v35  ;;  %v7296_v57 = vand.u32 4294901760, %v6252_v33  ;;  %v7298_v35 = vand.u32 4294901760, %v7282_v4  ;;  %v7304_v42 = vand.u32 4294901760, %v7290_v1 }
  0xb6   : > { %5146 = vmatmul.mubr.f32.gmra.mrb[2].mxu0 %v6227_v8  ;;  %4914 = vmatprep.mubr.f32.mxu1 %v6077_v17 }
  0xb7   : > { %5148 = vmatprep.mubr.f32.mxu0 %v6232_v12 }
  0xb9   : > { %4915 = vmatmul.mubr.f32.vlgmr.msra.gmra.mrb[0].mxu1 %v6234_v13 }
  0xba   : > { %5149 = vmatmul.mubr.f32.gmra.mrb[4].mxu0 %v6236_v16  ;;  %4917 = vmatprep.mubr.f32.mxu1 %v6264_v49 }
  0xbb   : > { %5436 = vmatpush3.bf16.msra.mxu1 %v5433_v15  ;;  %5151 = vmatprep.mubr.f32.mxu0 %v6272_v58  ;;  %v7289_v15 = vld [vmem:[#allocation34_spill] sm:$0xff] }
  0xbc   : > { %5438 = vmatprep.subr.bf16.mxu1 %v6440_v46 }
  0xbd   : > { %4918 = vmatmul.mubr.f32.gmra.mrb[2].mxu1 %v6295_v9 }
  0xbe   : > { %5152 = vmatmul.mubr.f32.gmra.mrb[6].mxu0 %v6305_v43  ;;  %4920 = vmatprep.mubr.f32.mxu1 %v6341_v55 }
  0xbf   : > { %5154 = vmatprep.mubr.f32.mxu0 %v6357_v41 }
  0xc1   : > { %4921 = vmatmul.mubr.f32.gmra.mrb[4].mxu1 %v6373_v61 }
  0xc2   : > { %5155 = vmatmul.mubr.f32.gmra.mrb[8].mxu0 %v6390_v30  ;;  %4923 = vmatprep.mubr.f32.mxu1 %v6409_v45 }
  0xc3   : > { %5161 = vmatprep.mubr.f32.mxu0 %v6150_v40  ;;  %v7295_v40 = vand.u32 4294901760, %v6097_v23 }
  0xc5   : > { %4924 = vmatmul.mubr.f32.gmra.mrb[6].mxu1 %v6428_v10 }
  0xc6   : > { %5162 = vmatmul.mubr.f32.vlgmr.msra.gmra.mrb[0].mxu0 %v6242_v28  ;;  %4926 = vmatprep.mubr.f32.mxu1 %v6437_v26  ;;  %v7297_v28 = vand.u32 4294901760, %v6255_v36 }
  0xc7   : > { %5488 = vmatpush3.bf16.msra.mxu0 %v6380_v53  ;;  %5164 = vmatprep.mubr.f32.mxu0 %v6245_v29  ;;  %v7299_v29 = vand.u32 4294901760, %v7285_v50 }
  0xc8   : > { %5490 = vmatprep.subr.bf16.mxu0 %v5489_v47 }
  0xc9   : > { %4927 = vmatmul.mubr.f32.gmra.mrb[8].mxu1 %v6465_v14 }
  0xca   : > { %5165 = vmatmul.mubr.f32.gmra.mrb[2].mxu0 %v6249_v32  ;;  %4933 = vmatprep.mubr.f32.mxu1 %v6097_v23  ;;  %v7300_v32 = vand.u32 4294901760, %v7286_v18  ;;  %v7301_v23 = vand.u32 4294901760, %v7287_v52 }
  0xcb   : > { %5167 = vmatprep.mubr.f32.mxu0 %v6252_v33  ;;  %v7302_v33 = vand.u32 4294901760, %v7288_v19 }
  0xcd   : > { %4934 = vmatmul.mubr.f32.vlgmr.msra.gmra.mrb[0].mxu1 %v6255_v36  ;;  %v7303_v36 = vand.u32 4294901760, %v7289_v15 }
  0xce   : > { %5168 = vmatmul.mubr.f32.gmra.mrb[4].mxu0 %v7282_v4  ;;  %5440 = vmatpush3.bf16.msra.mxu1 %v6440_v46  ;;  %v7306_v4 = vand.u32 4294901760, %v6426_v2 }
  0xcf   : > { %4936 = vmatprep.mubr.f32.mxu1 %v7285_v50  ;;  %5442 = vmatprep.subr.bf16.mxu1 %v5441_v48  ;;  %v7310_v50 = vld [vmem:[#allocation8_spill] sm:$0xff] }
  0xd0   : > { %5170 = vmatprep.mubr.f32.mxu0 %v7286_v18  ;;  %v7311_v18 = vand.u32 4294901760, %v7310_v50 }
  0xd1   : > { %4937 = vmatmul.mubr.f32.gmra.mrb[2].mxu1 %v7287_v52 }
  0xd2   : > { %5171 = vmatmul.mubr.f32.gmra.mrb[6].mxu0 %v7288_v19  ;;  %4939 = vmatprep.mubr.f32.mxu1 %v7289_v15  ;;  %v1317_v52 = vsub.f32 %v7310_v50, %v7311_v18  ;;  %v7312_v19 = vld [vmem:[#allocation7_spill] sm:$0xff] }
  0xd3   : > { %5173 = vmatprep.mubr.f32.mxu0 %v7290_v1 }
  0xd5   : > { %4940 = vmatmul.mubr.f32.gmra.mrb[4].mxu1 %v6407_v56 }
  0xd6   : > { %5174 = vmatmul.mubr.f32.gmra.mrb[8].mxu0 %v6426_v2  ;;  %4942 = vmatprep.mubr.f32.mxu1 %v6435_v21  ;;  %v7309_v2 = vld [vmem:[#allocation11_spill] sm:$0xff]  ;;  %v4545_v21 = vld [vmem:[%s7145_s1 + $0xf8] sm:$0xff] }
  0xd7   : > { %5180 = vmatprep.mubr.f32.mxu0 %v7291_v31  ;;  %v2930_v51 = vsel %vm239_vm0, %v4545_v21, 0 }
  0xd8   : > { %v6697_v1 = vand.u32 4294901760, %v2930_v51 }
  0xd9   : > { %4943 = vmatmul.mubr.f32.gmra.mrb[6].mxu1 %v6453_v63 }
  0xda   : > { %5181 = vmatmul.mubr.f32.vlgmr.msra.gmra.mrb[0].mxu0 %v7292_v3  ;;  %4945 = vmatprep.mubr.f32.mxu1 %v6472_v22  ;;  %v4546_v22 = vld [vmem:[%s7145_s1 + $0x100] sm:$0xff]  ;;  %v4549_v3 = vld [vmem:[%s7145_s1 + $0x118] sm:$0xff] }
  0xdb   : > { %5492 = vmatpush3.bf16.msra.mxu0 %v5489_v47  ;;  %5183 = vmatprep.mubr.f32.mxu0 %v7293_v25  ;;  %v7305_v47 = vand.u32 4294901760, %v6407_v56  ;;  %v4544_v56 = vld [vmem:[%s7145_s1 + $0xf0] sm:$0xff]  ;;  %v2933_v5 = vsel %vm239_vm0, %v4546_v22, 0 }
  0xdc   : > { %5494 = vmatprep.subr.bf16.mxu0 %v6380_v53  ;;  %v6708_v25 = vand.u32 4294901760, %v2933_v5 }
  0xdd   : > { %4946 = vmatmul.mubr.f32.gmra.mrb[8].mxu1 %v6492_v11 }
  0xde   : > { %5184 = vmatmul.mubr.f32.gmra.mrb[2].mxu0 %v7294_v20  ;;  %4952 = vmatprep.mubr.f32.mxu1 %v7295_v40  ;;  %v6710_v20 = vand.u32 4294901760, %v2936_v38  ;;  %v4550_v40 = vld [vmem:[%s7145_s1 + $0x120] sm:$0xff] }
  0xdf   : > { %5186 = vmatprep.mubr.f32.mxu0 %v7296_v57 }
  0xe1   : > { %4953 = vmatmul.mubr.f32.vlgmr.msra.gmra.mrb[0].mxu1 %v7297_v28  ;;  %v6720_v28 = vsub.f32 %v2930_v51, %v6697_v1  ;;  %v7318_v51 = vld [vmem:[#allocation14_spill] sm:$0xff] }
  0xe2   : > { %5187 = vmatmul.mubr.f32.gmra.mrb[4].mxu0 %v7298_v35  ;;  %5444 = vmatpush3.bf16.msra.mxu1 %v5441_v48  ;;  %v7308_v48 = vand.u32 4294901760, %v6453_v63  ;;  %v3128_v63 = vand.u32 4294901760, %v3127_v37  ;;  %v2942_v35 = vsel %vm239_vm0, %v4549_v3, 0 }
  0xe3   : > { %4955 = vmatprep.mubr.f32.mxu1 %v7299_v29  ;;  %5446 = vmatprep.subr.bf16.mxu1 %v6440_v46 }
  0xe4   : > { %5189 = vmatprep.mubr.f32.mxu0 %v7300_v32 }
  0xe5   : > { %4956 = vmatmul.mubr.f32.gmra.mrb[2].mxu1 %v7301_v23  ;;  %v2945_v23 = vsel %vm239_vm0, %v4550_v40, 0 }
  0xe6   : > { %5190 = vmatmul.mubr.f32.gmra.mrb[6].mxu0 %v7302_v33  ;;  %4958 = vmatprep.mubr.f32.mxu1 %v7303_v36  ;;  %v6730_v33 = vsub.f32 %v2933_v5, %v6708_v25  ;;  %v7314_v36 = vld [vmem:[#allocation6_spill] sm:$0xff]  ;;  %v6752_v37 = vand.u32 4294901760, %v2945_v23  ;;  %v7319_v5 = vld [vmem:[#allocation12_spill] sm:$0xff] }
  0xe7   : > { %5192 = vmatprep.mubr.f32.mxu0 %v7304_v42  ;;  %v7315_v42 = vld [vmem:[#allocation5_spill] sm:$0xff] }
  0xe8   : > { %v6789_v18 = vsub.f32 %v2945_v23, %v6752_v37 }
  0xe9   : > { %4959 = vmatmul.mubr.f32.gmra.mrb[4].mxu1 %v7305_v47  ;;  %v6737_v47 = vsub.f32 %v7315_v42, %v7314_v36 }
  0xea   : > { %5193 = vmatmul.mubr.f32.gmra.mrb[8].mxu0 %v7306_v4  ;;  %4961 = vmatprep.mubr.f32.mxu1 %v7307_v44  ;;  %v4552_v4 = vld [vmem:[%s7145_s1 + $0x130] sm:$0xff] }
  0xeb   : > { %5199 = vmatprep.mubr.f32.mxu0 %v6130_v34  ;;  %v7211_v22 = vand.u32 4294901760, %v6737_v47 }
  0xed   : > { %4962 = vmatmul.mubr.f32.gmra.mrb[6].mxu1 %v7308_v48  ;;  %v7221_v48 = vand.u32 4294901760, %v6720_v28 }
  0xee   : > { %5200 = vmatmul.mubr.f32.vlgmr.msra.gmra.mrb[0].mxu0 %v6223_v6  ;;  %4964 = vmatprep.mubr.f32.mxu1 %v419_v60 }
  0xef   : > { %5496 = vmatpush3.bf16.msra.mxu0 %v6380_v53  ;;  %5202 = vmatprep.mubr.f32.mxu0 %v6225_v7  ;;  %v3134_v53 = vsub.f32 %v6525_v24, %v3133_v39  ;;  %v4548_v39 = vld [vmem:[%s7145_s1 + $0x110] sm:$0xff] }
  0xf0   : > { %5498 = vmatprep.subr.bf16.mxu0 %v6631_v27 }
  0xf1   : > { %4965 = vmatmul.mubr.f32.gmra.mrb[8].mxu1 %v429_v62  ;;  %v3135_v11 = vand.u32 4294901760, %v3134_v53  ;;  %v7316_v53 = vld [vmem:[#allocation13_spill] sm:$0xff] }
  0xf2   : > { %5203 = vmatmul.mubr.f32.gmra.mrb[2].mxu0 %v6227_v8  ;;  %4971 = vmatprep.mubr.f32.mxu1 %v6077_v17 }
  0xf3   : > { %5205 = vmatprep.mubr.f32.mxu0 %v6232_v12  ;;  %v6683_v62 = vpack.c.bf16 %v3135_v11, %v3128_v63  ;;  %v7218_v63 = vand.u32 4294901760, %v6730_v33 }
  0xf5   : > { %4972 = vmatmul.mubr.f32.vlgmr.msra.gmra.mrb[0].mxu1 %v6234_v13 }
  0xf6   : > { %5206 = vmatmul.mubr.f32.gmra.mrb[4].mxu0 %v6236_v16  ;;  %5448 = vmatpush3.bf16.msra.mxu1 %v6440_v46  ;;  %v2927_v46 = vsel %vm239_vm0, %v4544_v56, 0  ;;  %v7317_v56 = vld [vmem:[#allocation10_spill] sm:$0xff] }
  0xf7   : > { %4974 = vmatprep.mubr.f32.mxu1 %v6264_v49  ;;  %5208 = vmatprep.mubr.f32.mxu0 %v6272_v58  ;;  %v6679_v60 = vand.u32 4294901760, %v2927_v46 }
  0xf8   : > { %5450 = vmatprep.subr.bf16.mxu1 %v7309_v2 }
  0xf9   : > { %4975 = vmatmul.mubr.f32.gmra.mrb[2].mxu1 %v6295_v9  ;;  %v6702_v31 = vsub.f32 %v2927_v46, %v6679_v60  ;;  %v6756_v46 = vsub.f32 %v7317_v56, %v7316_v53 }
  0xfa   : > { %5209 = vmatmul.mubr.f32.gmra.mrb[6].mxu0 %v6305_v43  ;;  %4977 = vmatprep.mubr.f32.mxu1 %v6341_v55 }
  0xfb   : > { %5211 = vmatprep.mubr.f32.mxu0 %v6357_v41  ;;  %v7224_v29 = vand.u32 4294901760, %v6702_v31 }
  0xfd   : > { %4978 = vmatmul.mubr.f32.gmra.mrb[4].mxu1 %v6373_v61  ;;  %v3026_v21 = vsub.f32 %v6702_v31, %v7224_v29  ;;  %v7333_v29 = vld [vmem:[#allocation28_spill] sm:$0xff] }
  0xfe   : > { %5212 = vmatmul.mubr.f32.gmra.mrb[8].mxu0 %v6390_v30  ;;  %4980 = vmatprep.mubr.f32.mxu1 %v6409_v45 }
  0xff   : > { %5218 = vmatprep.mubr.f32.mxu0 %v6130_v34  ;;  %v7313_v34 = vand.u32 4294901760, %v7312_v19 }
 0x101   : > { %v1324_v15 = vsub.f32 %v7312_v19, %v7313_v34  ;;  %4981 = vmatmul.mubr.f32.gmra.mrb[6].mxu1 %v6428_v10  ;;  %v3027_v34 = vand.u32 4294901760, %v3026_v21 }
 0x102   : > { %5219 = vmatmul.mubr.f32.vlgmr.msra.gmra.mrb[0].mxu0 %v6223_v6  ;;  %4983 = vmatprep.mubr.f32.mxu1 %v6437_v26  ;;  %v2939_v6 = vsel %vm239_vm0, %v4548_v39, 0  ;;  %v3036_v39 = vsub.f32 %v6720_v28, %v7221_v48 }
 0x103   : > { %5221 = vmatprep.mubr.f32.mxu0 %v6225_v7  ;;  %5500 = vmatpush3.bf16.msra.mxu0 %v6631_v27  ;;  %v1318_v7 = vand.u32 4294901760, %v1317_v52  ;;  %v1325_v57 = vand.u32 4294901760, %v1324_v15  ;;  %v6726_v32 = vand.u32 4294901760, %v2939_v6 }
 0x104   : > { %5502 = vmatprep.subr.bf16.mxu0 %v6683_v62  ;;  %v3037_v42 = vand.u32 4294901760, %v3036_v39 }
 0x105   : > { %4984 = vmatmul.mubr.f32.gmra.mrb[8].mxu1 %v6465_v14  ;;  %v6747_v44 = vpack.c.bf16 %v1325_v57, %v1318_v7  ;;  %v7320_v57 = vld [vmem:[#allocation16_spill] sm:$0xff] }
 0x106   : > { %5222 = vmatmul.mubr.f32.gmra.mrb[2].mxu0 %v6227_v8  ;;  %4990 = vmatprep.mubr.f32.mxu1 %v6077_v17  ;;  %v6733_v8 = vsub.f32 %v2936_v38, %v6710_v20  ;;  %v4551_v17 = vld [vmem:[%s7145_s1 + $0x128] sm:$0xff]  ;;  %v6780_v38 = vsub.f32 %v7319_v5, %v7318_v51  ;;  %v7323_v5 = vld [vmem:[#allocation17_spill] sm:$0xff] }
 0x107   : > { %5224 = vmatprep.mubr.f32.mxu0 %v6232_v12  ;;  %v6742_v12 = vand.u32 4294901760, %v2942_v35 }
 0x108   : > { %v7213_v11 = vand.u32 4294901760, %v6733_v8  ;;  %v7214_v7 = vand.u32 4294901760, %v6780_v38 }
 0x109   : > { %4991 = vmatmul.mubr.f32.vlgmr.msra.gmra.mrb[0].mxu1 %v6234_v13  ;;  %v6764_v13 = vsub.f32 %v2939_v6, %v6726_v32  ;;  %v6776_v0 = vsub.f32 %v2942_v35, %v6742_v12  ;;  %v3046_v6 = vsub.f32 %v6730_v33, %v7218_v63  ;;  %v7321_v35 = vld [vmem:[#allocation15_spill] sm:$0xff] }
 0x10a   : > { %5225 = vmatmul.mubr.f32.gmra.mrb[4].mxu0 %v6236_v16  ;;  %4993 = vmatprep.mubr.f32.mxu1 %v6264_v49  ;;  %v2948_v16 = vsel %vm239_vm0, %v4551_v17, 0  ;;  %v2951_v49 = vsel %vm239_vm0, %v4552_v4, 0  ;;  %v3056_v40 = vsub.f32 %v6733_v8, %v7213_v11  ;;  %v6813_v23 = vsub.f32 %v7321_v35, %v7320_v57 }
 0x10b   : > { %5227 = vmatprep.mubr.f32.mxu0 %v6272_v58  ;;  %5452 = vmatpush3.bf16.msra.mxu1 %v7309_v2  ;;  %v4553_v58 = vld [vmem:[%s7145_s1 + $0x138] sm:$0xff]  ;;  %v6791_v52 = vand.u32 4294901760, %v2948_v16  ;;  %v7212_v15 = vand.u32 4294901760, %v6764_v13  ;;  %v6796_v3 = vand.u32 4294901760, %v2951_v49  ;;  %v7216_v17 = vand.u32 4294901760, %v6789_v18 }
 0x10c   : > { %5454 = vmatprep.subr.bf16.mxu1 %v6747_v44  ;;  %v3047_v39 = vand.u32 4294901760, %v3046_v6  ;;  %v3057_v35 = vand.u32 4294901760, %v3056_v40  ;;  %v6851_v6 = vpack.c.bf16 %v6525_v24, %v6520_v54  ;;  %v7327_v54 = vld [vmem:[#allocation22_spill] sm:$0xff]  ;;  %v7328_v24 = vld [vmem:[#allocation20_spill] sm:$0xff] }
 0x10d   : > { %4994 = vmatmul.mubr.f32.gmra.mrb[2].mxu1 %v6295_v9  ;;  %v2954_v9 = vsel %vm239_vm0, %v4553_v58, 0  ;;  %v6819_v4 = vsub.f32 %v2948_v16, %v6791_v52  ;;  %v3066_v21 = vsub.f32 %v6764_v13, %v7212_v15  ;;  %v7322_v58 = vld [vmem:[#allocation18_spill] sm:$0xff]  ;;  %v7324_v15 = vld [vmem:[#allocation21_spill] sm:$0xff]  ;;  %v3086_v40 = vsub.f32 %v6789_v18, %v7216_v17 }
 0x10e   : > { %5228 = vmatmul.mubr.f32.gmra.mrb[6].mxu0 %v6305_v43  ;;  %4996 = vmatprep.mubr.f32.mxu1 %v6341_v55  ;;  %v7217_v43 = vand.u32 4294901760, %v6756_v46  ;;  %v7215_v55 = vand.u32 4294901760, %v6776_v0  ;;  %v6821_v56 = vand.u32 4294901760, %v2954_v9 }
 0x10f   : > { %5230 = vmatprep.mubr.f32.mxu0 %v6357_v41  ;;  %v1216_v41 = vsub.f32 %v6737_v47, %v7211_v22 }
 0x110   : > { %v1226_v22 = vsub.f32 %v6756_v46, %v7217_v43 }
 0x111   : > { %4997 = vmatmul.mubr.f32.gmra.mrb[4].mxu1 %v6373_v61  ;;  %v6829_v61 = vsub.f32 %v7323_v5, %v7322_v58  ;;  %v1217_v16 = vand.u32 4294901760, %v1216_v41  ;;  %v7220_v5 = vand.u32 4294901760, %v6813_v23  ;;  %v7219_v41 = vand.u32 4294901760, %v6819_v4 }
 0x112   : > { %5231 = vmatmul.mubr.f32.gmra.mrb[8].mxu0 %v6390_v30  ;;  %4999 = vmatprep.mubr.f32.mxu1 %v6409_v45  ;;  %v6832_v30 = vsub.f32 %v2951_v49, %v6796_v3  ;;  %v3076_v45 = vsub.f32 %v6776_v0, %v7215_v55  ;;  %v7325_v49 = vld [vmem:[#allocation19_spill] sm:$0xff]  ;;  %v6866_v55 = vsub.f32 %v7328_v24, %v7327_v54  ;;  %v1227_v17 = vand.u32 4294901760, %v1226_v22 }
 0x113   : > { %5237 = vmatprep.mubr.f32.mxu0 %v3027_v34  ;;  %v1236_v34 = vsub.f32 %v6780_v38, %v7214_v7  ;;  %v6846_v11 = vsub.f32 %v7325_v49, %v7324_v15  ;;  %v6858_v7 = vsub.f32 %v2954_v9, %v6821_v56  ;;  %v3067_v49 = vand.u32 4294901760, %v3066_v21  ;;  %v7330_v22 = vld [vmem:[#allocation23_spill] sm:$0xff] }
 0x114   : > { %v3077_v43 = vand.u32 4294901760, %v3076_v45  ;;  %v3087_v21 = vand.u32 4294901760, %v3086_v40  ;;  %v3096_v24 = vsub.f32 %v6819_v4, %v7219_v41  ;;  %v7331_v40 = vld [vmem:[#allocation26_spill] sm:$0xff]  ;;  %v7332_v41 = vld [vmem:[#allocation24_spill] sm:$0xff] }
 0x115   : > { %7326 = vst [vmem:[#allocation29_spill] sm:$0xff] %v6846_v11  ;;  %5000 = vmatmul.mubr.f32.gmra.mrb[6].mxu1 %v6428_v10  ;;  %v7223_v10 = vand.u32 4294901760, %v6829_v61  ;;  %v1237_v9 = vand.u32 4294901760, %v1236_v34  ;;  %v3115_v63 = vand.u32 4294901760, %v6858_v7 }
 0x116   : > { %5238 = vmatmul.mubr.f32.vlgmr.msra.gmra.mrb[0].mxu0 %v3037_v42  ;;  %5002 = vmatprep.mubr.f32.mxu1 %v6437_v26  ;;  %v7222_v42 = vand.u32 4294901760, %v6832_v30  ;;  %v7225_v26 = vand.u32 4294901760, %v6846_v11 }
 0x117   : > { %5504 = vmatpush3.bf16.msra.mxu0 %v6683_v62  ;;  %5240 = vmatprep.mubr.f32.mxu0 %v3047_v39  ;;  %v1246_v62 = vsub.f32 %v6813_v23, %v7220_v5  ;;  %v7329_v39 = vld [vmem:[#allocation25_spill] sm:$0xff]  ;;  %v1256_v34 = vsub.f32 %v6829_v61, %v7223_v10  ;;  %v6891_v5 = vsub.f32 %v7332_v41, %v7331_v40  ;;  %v7334_v41 = vld [vmem:[#allocation27_spill] sm:$0xff] }
 0x118   : > { %5506 = vmatprep.subr.bf16.mxu0 %v6851_v6  ;;  %v6880_v45 = vsub.f32 %v7330_v22, %v7329_v39  ;;  %v3097_v22 = vand.u32 4294901760, %v3096_v24 }
 0x119   : > { %5003 = vmatmul.mubr.f32.gmra.mrb[8].mxu1 %v6465_v14  ;;  %v3106_v14 = vsub.f32 %v6832_v30, %v7222_v42  ;;  %v1247_v48 = vand.u32 4294901760, %v1246_v62  ;;  %v3116_v42 = vsub.f32 %v6858_v7, %v3115_v63  ;;  %v1257_v62 = vand.u32 4294901760, %v1256_v34 }
 0x11a   : > { %5241 = vmatmul.mubr.f32.gmra.mrb[2].mxu0 %v3057_v35  ;;  %5009 = vmatprep.mubr.f32.mxu1 %v1217_v16  ;;  %v1266_v16 = vsub.f32 %v6846_v11, %v7225_v26  ;;  %v1285_v10 = vand.u32 4294901760, %v6880_v45  ;;  %v6904_v35 = vsub.f32 %v7334_v41, %v7333_v29  ;;  %v7335_v11 = vand.u32 4294901760, %v6866_v55 }
 0x11b   : > { %5243 = vmatprep.mubr.f32.mxu0 %v3067_v49  ;;  %v5457_v49 = vpack.c.bf16 %v7312_v19, %v7310_v50  ;;  %v3107_v26 = vand.u32 4294901760, %v3106_v14  ;;  %v1295_v19 = vand.u32 4294901760, %v6891_v5  ;;  %v7345_v34 = vand.u32 4294901760, %v6776_v0 }
 0x11c   : > { %v1276_v50 = vsub.f32 %v6866_v55, %v7335_v11  ;;  %v7347_v14 = vand.u32 4294901760, %v6789_v18 }
 0x11d   : > { %5010 = vmatmul.mubr.f32.vlgmr.msra.gmra.mrb[0].mxu1 %v1227_v17  ;;  %v3117_v17 = vand.u32 4294901760, %v3116_v42  ;;  %v1296_v11 = vsub.f32 %v6891_v5, %v1295_v19 }
 0x11e   : > { %5244 = vmatmul.mubr.f32.gmra.mrb[4].mxu0 %v3077_v43  ;;  %5012 = vmatprep.mubr.f32.mxu1 %v1237_v9  ;;  %v1267_v43 = vand.u32 4294901760, %v1266_v16  ;;  %v1286_v9 = vsub.f32 %v6880_v45, %v1285_v10  ;;  %v1277_v24 = vand.u32 4294901760, %v1276_v50 }
 0x11f   : > { %5246 = vmatprep.mubr.f32.mxu0 %v3087_v21  ;;  %5456 = vmatpush3.bf16.msra.mxu1 %v6747_v44  ;;  %v1305_v21 = vand.u32 4294901760, %v6904_v35  ;;  %v1297_v42 = vand.u32 4294901760, %v1296_v11 }
 0x120   : > { %5458 = vmatprep.subr.bf16.mxu1 %v5457_v49  ;;  %v1287_v44 = vand.u32 4294901760, %v1286_v9 }
 0x121   : > { %5013 = vmatmul.mubr.f32.gmra.mrb[2].mxu1 %v1247_v48  ;;  %v1306_v48 = vsub.f32 %v6904_v35, %v1305_v21 }
 0x122   : > { %5247 = vmatmul.mubr.f32.gmra.mrb[6].mxu0 %v3097_v22  ;;  %5015 = vmatprep.mubr.f32.mxu1 %v1257_v62 }
 0x123   : > { %5249 = vmatprep.mubr.f32.mxu0 %v3107_v26  ;;  %v1307_v26 = vand.u32 4294901760, %v1306_v48 }
 0x125   : > { %5016 = vmatmul.mubr.f32.gmra.mrb[4].mxu1 %v1267_v43 }
 0x126   : > { %5250 = vmatmul.mubr.f32.gmra.mrb[8].mxu0 %v3117_v17  ;;  %5018 = vmatprep.mubr.f32.mxu1 %v1277_v24 }
 0x127   : > { %5256 = vmatprep.mubr.f32.mxu0 %v6679_v60 }
 0x129   : > { %5019 = vmatmul.mubr.f32.gmra.mrb[6].mxu1 %v1287_v44 }
 0x12a   : > { %5257 = vmatmul.mubr.f32.vlgmr.msra.gmra.mrb[0].mxu0 %v6697_v1  ;;  %5021 = vmatprep.mubr.f32.mxu1 %v1297_v42 }
 0x12b   : > { %5508 = vmatpush3.bf16.msra.mxu0 %v6851_v6  ;;  %5259 = vmatprep.mubr.f32.mxu0 %v6708_v25  ;;  %v7341_v6 = vand.u32 4294901760, %v6733_v8 }
 0x12c   : > { %5510 = vmatprep.subr.bf16.mxu0 %v6631_v27 }
 0x12d   : > { %5022 = vmatmul.mubr.f32.gmra.mrb[8].mxu1 %v1307_v26 }
 0x12e   : > { %5260 = vmatmul.mubr.f32.gmra.mrb[2].mxu0 %v6710_v20  ;;  %5028 = vmatprep.mubr.f32.mxu1 %v7314_v36  ;;  %v7336_v36 = vld [vmem:[#allocation9_spill] sm:$0xff] }
 0x12f   : > { %5262 = vmatprep.mubr.f32.mxu0 %v6726_v32 }
 0x131   : > { %5029 = vmatmul.mubr.f32.vlgmr.msra.gmra.mrb[0].mxu1 %v7316_v53  ;;  %v7337_v53 = vld [vmem:[#allocation29_spill] sm:$0xff] }
 0x132   : > { %5263 = vmatmul.mubr.f32.gmra.mrb[4].mxu0 %v6742_v12  ;;  %5031 = vmatprep.mubr.f32.mxu1 %v7318_v51  ;;  %v7338_v51 = vand.u32 4294901760, %v6702_v31 }
 0x133   : > { %5265 = vmatprep.mubr.f32.mxu0 %v6752_v37  ;;  %5460 = vmatpush3.bf16.msra.mxu1 %v5457_v49 }
 0x134   : > { %5462 = vmatprep.subr.bf16.mxu1 %v7309_v2 }
 0x135   : > { %5032 = vmatmul.mubr.f32.gmra.mrb[2].mxu1 %v7320_v57  ;;  %v7340_v57 = vand.u32 4294901760, %v6730_v33 }
 0x136   : > { %5266 = vmatmul.mubr.f32.gmra.mrb[6].mxu0 %v6791_v52  ;;  %5034 = vmatprep.mubr.f32.mxu1 %v7322_v58 }
 0x137   : > { %5268 = vmatprep.mubr.f32.mxu0 %v6796_v3 }
 0x139   : > { %5035 = vmatmul.mubr.f32.gmra.mrb[4].mxu1 %v7324_v15 }
 0x13a   : > { %5269 = vmatmul.mubr.f32.gmra.mrb[8].mxu0 %v6821_v56  ;;  %5037 = vmatprep.mubr.f32.mxu1 %v7327_v54 }
 0x13b   : > { %5275 = vmatprep.mubr.f32.mxu0 %v6702_v31  ;;  %v7342_v31 = vand.u32 4294901760, %v6737_v47 }
 0x13d   : > { %5038 = vmatmul.mubr.f32.gmra.mrb[6].mxu1 %v7329_v39 }
 0x13e   : > { %5276 = vmatmul.mubr.f32.vlgmr.msra.gmra.mrb[0].mxu0 %v6720_v28  ;;  %5040 = vmatprep.mubr.f32.mxu1 %v7331_v40 }
 0x13f   : > { %5512 = vmatpush3.bf16.msra.mxu0 %v6631_v27  ;;  %5278 = vmatprep.mubr.f32.mxu0 %v6730_v33  ;;  %v7346_v33 = vand.u32 4294901760, %v6780_v38 }
 0x140   : > { %5514 = vmatprep.subr.bf16.mxu0 %v6538_v59 }
 0x141   : > { %5041 = vmatmul.mubr.f32.gmra.mrb[8].mxu1 %v7333_v29 }
 0x142   : > { %5279 = vmatmul.mubr.f32.gmra.mrb[2].mxu0 %v6733_v8  ;;  %5047 = vmatprep.mubr.f32.mxu1 %v6737_v47  ;;  %v7348_v8 = vand.u32 4294901760, %v6813_v23  ;;  %v7349_v47 = vand.u32 4294901760, %v6819_v4 }
 0x143   : > { %5281 = vmatprep.mubr.f32.mxu0 %v6764_v13 }
 0x145   : > { %5048 = vmatmul.mubr.f32.vlgmr.msra.gmra.mrb[0].mxu1 %v6756_v46 }
 0x146   : > { %5282 = vmatmul.mubr.f32.gmra.mrb[4].mxu0 %v6776_v0  ;;  %5050 = vmatprep.mubr.f32.mxu1 %v6780_v38  ;;  %v7352_v0 = vand.u32 4294901760, %v7337_v53  ;;  %v7353_v38 = vand.u32 4294901760, %v6866_v55 }
 0x147   : > { %5284 = vmatprep.mubr.f32.mxu0 %v6789_v18  ;;  %5464 = vmatpush3.bf16.msra.mxu1 %v7309_v2  ;;  %v7339_v2 = vand.u32 4294901760, %v6720_v28  ;;  %v7343_v28 = vand.u32 4294901760, %v6764_v13  ;;  %v7351_v13 = vand.u32 4294901760, %v6832_v30 }
 0x148   : > { %5569 = vmatprep.subr.bf16.mxu1 %v7336_v36 }
 0x149   : > { %5051 = vmatmul.mubr.f32.gmra.mrb[2].mxu1 %v6813_v23 }
 0x14a   : > { %5285 = vmatmul.mubr.f32.gmra.mrb[6].mxu0 %v6819_v4  ;;  %5053 = vmatprep.mubr.f32.mxu1 %v6829_v61 }
 0x14b   : > { %5287 = vmatprep.mubr.f32.mxu0 %v6832_v30 }
 0x14d   : > { %5054 = vmatmul.mubr.f32.gmra.mrb[4].mxu1 %v7337_v53 }
 0x14e   : > { %5288 = vmatmul.mubr.f32.gmra.mrb[8].mxu0 %v6858_v7  ;;  %5056 = vmatprep.mubr.f32.mxu1 %v6866_v55 }
 0x14f   : > { %5294 = vmatprep.mubr.f32.mxu0 %v7338_v51 }
 0x151   : > { %5057 = vmatmul.mubr.f32.gmra.mrb[6].mxu1 %v6880_v45 }
 0x152   : > { %5295 = vmatmul.mubr.f32.vlgmr.msra.gmra.mrb[0].mxu0 %v7339_v2  ;;  %5059 = vmatprep.mubr.f32.mxu1 %v6891_v5 }
 0x153   : > { %5516 = vmatpush3.bf16.msra.mxu0 %v6538_v59  ;;  %5297 = vmatprep.mubr.f32.mxu0 %v7340_v57  ;;  %v7344_v59 = vand.u32 4294901760, %v6756_v46  ;;  %v7350_v46 = vand.u32 4294901760, %v6829_v61 }
 0x154   : > { %5518 = vmatprep.subr.bf16.mxu0 %v6631_v27 }
 0x155   : > { %5060 = vmatmul.mubr.f32.gmra.mrb[8].mxu1 %v6904_v35 }
 0x156   : > { %5298 = vmatmul.mubr.f32.gmra.mrb[2].mxu0 %v7341_v6  ;;  %5066 = vmatprep.mubr.f32.mxu1 %v7342_v31 }
 0x157   : > { %5300 = vmatprep.mubr.f32.mxu0 %v7343_v28  ;;  %v3863_v28 = vld [vmem:[%s7146_s2 + $0x8] sm:$0xff] }
 0x159   : > { %5067 = vmatmul.mubr.f32.vlgmr.msra.gmra.mrb[0].mxu1 %v7344_v59 }
 0x15a   : > { %5301 = vmatmul.mubr.f32.gmra.mrb[4].mxu0 %v7345_v34  ;;  %5069 = vmatprep.mubr.f32.mxu1 %v7346_v33 }
 0x15b   : > { %5303 = vmatprep.mubr.f32.mxu0 %v7347_v14  ;;  %5570 = vmatpush3.bf16.msra.mxu1 %v7336_v36  ;;  %v3869_v14 = vsel %vm3864_vm4, %v3863_v28, 0 }
 0x15d   : > { %5070 = vmatmul.mubr.f32.gmra.mrb[2].mxu1 %v7348_v8 }
 0x15e   : > { %5304 = vmatmul.mubr.f32.gmra.mrb[6].mxu0 %v7349_v47  ;;  %5072 = vmatprep.mubr.f32.mxu1 %v7350_v46 }
 0x15f   : > { %5306 = vmatprep.mubr.f32.mxu0 %v7351_v13 }
 0x161   : > { %5073 = vmatmul.mubr.f32.gmra.mrb[4].mxu1 %v7352_v0 }
 0x162   : > { %5307 = vmatmul.mubr.f32.gmra.mrb[8].mxu0 %v3115_v63  ;;  %5075 = vmatprep.mubr.f32.mxu1 %v7353_v38  ;;  %v7055_v38 = vand.u32 4294901760, %v3869_v14 }
 0x163   : > { %5313 = vmatprep.mubr.f32.mxu0 %v6679_v60 }
 0x165   : > { %5076 = vmatmul.mubr.f32.gmra.mrb[6].mxu1 %v1285_v10 }
 0x166   : > { %5314 = vmatmul.mubr.f32.vlgmr.msra.gmra.mrb[0].mxu0 %v6697_v1  ;;  %5078 = vmatprep.mubr.f32.mxu1 %v1295_v19 }
 0x167   : > { %5520 = vmatpush3.bf16.msra.mxu0 %v6631_v27  ;;  %5316 = vmatprep.mubr.f32.mxu0 %v6708_v25  ;;  %v3862_v27 = vld [vmem:[%s7146_s2] sm:$0xff] }
 0x169   : > { %5079 = vmatmul.mubr.f32.gmra.mrb[8].mxu1 %v1305_v21 }
 0x16a   : > { %5317 = vmatmul.mubr.f32.gmra.mrb[2].mxu0 %v6710_v20  ;;  %5091 = vmatprep.mubr.f32.mxu1 %v7322_v58 }
 0x16b   : > { %5319 = vmatprep.mubr.f32.mxu0 %v6726_v32 }
 0x16d   : > { %5092 = vmatmul.mubr.f32.vlgmr.msra.gmra.mrb[4].mxu1 %v7324_v15 }
 0x16e   : > { %5320 = vmatmul.mubr.f32.gmra.mrb[4].mxu0 %v6742_v12  ;;  %5094 = vmatprep.mubr.f32.mxu1 %v7327_v54 }
 0x16f   : > { %5322 = vmatprep.mubr.f32.mxu0 %v6752_v37 }
 0x171   : > { %5095 = vmatmul.mubr.f32.gmra.mrb[6].mxu1 %v7329_v39 }
 0x172   : > { %5323 = vmatmul.mubr.f32.gmra.mrb[6].mxu0 %v6791_v52  ;;  %5097 = vmatprep.mubr.f32.mxu1 %v7331_v40 }
 0x173   : > { %5325 = vmatprep.mubr.f32.mxu0 %v6796_v3 }
 0x175   : > { %5098 = vmatmul.mubr.f32.gmra.mrb[8].mxu1 %v7333_v29 }
 0x176   : > { %5326 = vmatmul.mubr.f32.gmra.mrb[8].mxu0 %v6821_v56 }
 0x177   : > { %5332 = vmatprep.mubr.f32.mxu0 %v6679_v60  ;;  %v3866_v60 = vsel %vm3864_vm4, %v3862_v27, 0 }
 0x17a   : > { %5333 = vmatmul.mubr.f32.vlgmr.msra.gmra.mrb[0].mxu0 %v6697_v1  ;;  %v7042_v1 = vand.u32 4294901760, %v3866_v60 }
 0x17b   : > { %5335 = vmatprep.mubr.f32.mxu0 %v6708_v25 }
 0x17c   : > { %v7045_v25 = vsub.f32 %v3866_v60, %v7042_v1 }
 0x17e   : > { %5336 = vmatmul.mubr.f32.gmra.mrb[2].mxu0 %v6710_v20  ;;  %v3943_v20 = vand.u32 4294901760, %v7045_v25 }
 0x17f   : > { %5338 = vmatprep.mubr.f32.mxu0 %v6726_v32 }
 0x180   : > { %v3944_v29 = vsub.f32 %v7045_v25, %v3943_v20 }
 0x182   : > { %5339 = vmatmul.mubr.f32.gmra.mrb[4].mxu0 %v6742_v12  ;;  %v3945_v32 = vand.u32 4294901760, %v3944_v29 }
 0x183   : > { %5341 = vmatprep.mubr.f32.mxu0 %v6752_v37 }
 0x184   : > { %5357 = vmatprep.mubr.f32.mxu1 %v3945_v32 }
 0x186   : > { %5342 = vmatmul.mubr.f32.gmra.mrb[6].mxu0 %v6791_v52 }
 0x187   : > { %5344 = vmatprep.mubr.f32.mxu0 %v6796_v3 }
 0x18a   : > { %5345 = vmatmul.mubr.f32.gmra.mrb[8].mxu0 %v6821_v56 }
 0x22c   : > { %v5068_v12 = vpop.f32.mrb[0].mxu1 }
 0x22d   : > { %v1658_v37 = vpop.f32.mrb[1].mxu1 }
 0x230   : > { %v5071_v63 = vpop.f32.mrb[2].mxu1 }
 0x231   : > { %v1674_v18 = vpop.f32.mrb[3].mxu1 }
 0x240   : > { %v5093_v52 = vpop.f32.mrb[4].mxu1 }
 0x241   : > { %v1831_v15 = vpop.f32.mrb[5].mxu1 }
 0x244   : > { %v5096_v3 = vpop.f32.mrb[6].mxu1 }
 0x245   : > { %v1843_v55 = vpop.f32.mrb[7].mxu1 }
 0x248   : > { %v5099_v7 = vpop.f32.mrb[8].mxu1 }
 0x249   : > { %v1855_v23 = vpop.f32.mrb[9].mxu1 }
 0x24d   : > { %v5334_v4 = vpop.f32.mrb[0].mxu0 }
 0x24e   : > { %v5571_v56 = vadd.f32 %v5334_v4, %v5068_v12  ;;  %v3744_v58 = vpop.f32.mrb[1].mxu0 }
 0x24f   : > { %v5572_v61 = vadd.f32 %v3744_v58, %v1658_v37 }
 0x250   : > { %v3813_v43 = vmul.f32 %v5571_v56, %v5571_v56 }
 0x251   : > { %v5337_v30 = vpop.f32.mrb[2].mxu0  ;;  %v3812_v16 = vmul.f32 %v5572_v61, %v5572_v61 }
 0x252   : > { %v5573_v5 = vadd.f32 %v5337_v30, %v5071_v63  ;;  %v3756_v10 = vpop.f32.mrb[3].mxu0 }
 0x253   : > { %v5574_v54 = vadd.f32 %v3756_v10, %v1674_v18 }
 0x254   : > { %v3815_v57 = vmul.f32 %v5573_v5, %v5573_v5 }
 0x255   : > { %v5340_v39 = vpop.f32.mrb[4].mxu0  ;;  %v3814_v17 = vmul.f32 %v5574_v54, %v5574_v54 }
 0x256   : > { %v5575_v45 = vadd.f32 %v5340_v39, %v5093_v52  ;;  %v3768_v35 = vpop.f32.mrb[5].mxu0 }
 0x257   : > { %v5576_v40 = vadd.f32 %v3768_v35, %v1831_v15 }
 0x258   : > { %v3817_v49 = vmul.f32 %v5575_v45, %v5575_v45 }
 0x259   : > { %v5343_v22 = vpop.f32.mrb[6].mxu0  ;;  %v3816_v53 = vmul.f32 %v5576_v40, %v5576_v40 }
 0x25a   : > { %v3822_v41 = vadd.f32 %v3817_v49, %v3812_v16  ;;  %v5577_v62 = vadd.f32 %v5343_v22, %v5096_v3  ;;  %v3780_v50 = vpop.f32.mrb[7].mxu0 }
 0x25b   : > { %v5578_v19 = vadd.f32 %v3780_v50, %v1843_v55 }
 0x25c   : > { %5871 = vrsqrt.f32 %v3822_v41  ;;  %v3819_v9 = vmul.f32 %v5577_v62, %v5577_v62  ;;  %vm3829_vm5 = vcmp.eq.f32.partialorder %v3822_v41, inf  ;;  %v3832_v34 = vand.u32 2147483648, %v3822_v41 }
 0x25d   : > { %v3818_v21 = vmul.f32 %v5578_v19, %v5578_v19  ;;  %v5346_v24 = vpop.f32.mrb[8].mxu0  ;;  %vm3831_vm6 = vcmp.eq.f32.partialorder %v3822_v41, 0.0 }
 0x25e   : > { %v5579_v11 = vadd.f32 %v5346_v24, %v5099_v7  ;;  %v3792_v44 = vpop.f32.mrb[9].mxu0  ;;  %v3824_v48 = vadd.f32 %v3819_v9, %v3814_v17 }
 0x25f   : > { %v3823_v42 = vadd.f32 %v3818_v21, %v3813_v43  ;;  %v5580_v26 = vadd.f32 %v3792_v44, %v1855_v23  ;;  %v7058_v23 = vsub.f32 %v3869_v14, %v7055_v38 }
 0x260   : > { %v3821_v36 = vmul.f32 %v5579_v11, %v5579_v11  ;;  %5873 = vrsqrt.f32 %v3824_v48  ;;  %vm3843_vm7 = vcmp.eq.f32.partialorder %v3824_v48, inf  ;;  %vm3845_vm8 = vcmp.eq.f32.partialorder %v3824_v48, 0.0 }
 0x261   : > { %5875 = vrsqrt.f32 %v3823_v42  ;;  %v3820_v2 = vmul.f32 %v5580_v26, %v5580_v26  ;;  %v3846_v27 = vand.u32 2147483648, %v3824_v48  ;;  %vm3836_vm9 = vcmp.eq.f32.partialorder %v3823_v42, inf }
 0x262   : > { %v3826_v51 = vadd.f32 %v3821_v36, %v3816_v53  ;;  %v3839_v32 = vand.u32 2147483648, %v3823_v42  ;;  %vm3838_vm10 = vcmp.eq.f32.partialorder %v3823_v42, 0.0  ;;  %v3953_v40 = vand.u32 4294901760, %v7058_v23 }
 0x263   : > { %v3825_v31 = vadd.f32 %v3820_v2, %v3815_v57 }
 0x264   : > { %5877 = vrsqrt.f32 %v3826_v51  ;;  %vm3857_vm11 = vcmp.eq.f32.partialorder %v3826_v51, inf  ;;  %v3860_v55 = vand.u32 2147483648, %v3826_v51  ;;  %vm3859_vm12 = vcmp.eq.f32.partialorder %v3826_v51, 0.0 }
 0x265   : > { %5879 = vrsqrt.f32 %v3825_v31  ;;  %vm3850_vm13 = vcmp.eq.f32.partialorder %v3825_v31, inf  ;;  %v3853_v54 = vand.u32 2147483648, %v3825_v31  ;;  %vm3852_vm14 = vcmp.eq.f32.partialorder %v3825_v31, 0.0 }
 0x266   : > { %v5872_v6 = vpop.eup %5871  ;;  %v3954_v9 = vsub.f32 %v7058_v23, %v3953_v40 }
 0x267   : > { %v3828_v59 = vmul.f32 %v5872_v6, %v3822_v41 }
 0x268   : > { %v3955_v53 = vand.u32 4294901760, %v3954_v9 }
 0x269   : > { %v3830_v33 = vsel %vm3829_vm5, %v3822_v41, %v3828_v59 }
 0x26a   : > { %v3833_v8 = vsel %vm3831_vm6, %v3832_v34, %v3830_v33  ;;  %v5874_v47 = vpop.eup %5873 }
 0x26b   : > { %v3872_v46 = vand.u32 4294901760, %v3833_v8  ;;  %v5876_v13 = vpop.eup %5875  ;;  %v3842_v0 = vmul.f32 %v5874_v47, %v3824_v48 }
 0x26c   : > { %v3835_v60 = vmul.f32 %v5876_v13, %v3823_v42 }
 0x26d   : > { %v3844_v29 = vsel %vm3843_vm7, %v3824_v48, %v3842_v0  ;;  %v3963_v12 = vsub.f32 %v3833_v8, %v3872_v46 }
 0x26e   : > { %v5878_v37 = vpop.eup %5877  ;;  %v3837_v63 = vsel %vm3836_vm9, %v3823_v42, %v3835_v60  ;;  %v3847_v18 = vsel %vm3845_vm8, %v3846_v27, %v3844_v29 }
 0x26f   : > { %v3856_v52 = vmul.f32 %v5878_v37, %v3826_v51  ;;  %v3840_v15 = vsel %vm3838_vm10, %v3839_v32, %v3837_v63  ;;  %v3878_v3 = vand.u32 4294901760, %v3847_v18  ;;  %v5880_v4 = vpop.eup %5879  ;;  %v3964_v58 = vand.u32 4294901760, %v3963_v12 }
 0x270   : > { %v3875_v7 = vand.u32 4294901760, %v3840_v15  ;;  %v3849_v30 = vmul.f32 %v5880_v4, %v3825_v31 }
 0x271   : > { %v3858_v56 = vsel %vm3857_vm11, %v3826_v51, %v3856_v52  ;;  %v3977_v10 = vsub.f32 %v3847_v18, %v3878_v3  ;;  %v3965_v49 = vsub.f32 %v3963_v12, %v3964_v58 }
 0x272   : > { %v3861_v61 = vsel %vm3859_vm12, %v3860_v55, %v3858_v56  ;;  %v7060_v5 = vpack.c.bf16 %v3875_v7, %v3872_v46  ;;  %v3970_v39 = vsub.f32 %v3840_v15, %v3875_v7  ;;  %v3851_v45 = vsel %vm3850_vm13, %v3825_v31, %v3849_v30 }
 0x273   : > { %v7063_v35 = vand.u32 4294901760, %v3861_v61  ;;  %v3854_v16 = vsel %vm3852_vm14, %v3853_v54, %v3851_v45  ;;  %v3978_v62 = vand.u32 4294901760, %v3977_v10  ;;  %v3966_v11 = vand.u32 4294901760, %v3965_v49 }
 0x274   : > { %5522 = vmatprep.subr.bf16.mxu1 %v7060_v5  ;;  %v3971_v22 = vand.u32 4294901760, %v3970_v39  ;;  %v3881_v41 = vand.u32 4294901760, %v3854_v16  ;;  %v5537_v50 = vpack.c.bf16 %v3970_v39, %v3963_v12 }
 0x275   : > { %5524 = vmatpush3.bf16.msra.mxu1 %v7060_v5  ;;  %v3991_v24 = vsub.f32 %v3861_v61, %v7063_v35  ;;  %v3979_v48 = vsub.f32 %v3977_v10, %v3978_v62 }
 0x276   : > { %v3972_v19 = vsub.f32 %v3970_v39, %v3971_v22  ;;  %v5553_v43 = vpack.c.bf16 %v3971_v22, %v3964_v58  ;;  %v5525_v17 = vpack.c.bf16 %v3881_v41, %v3878_v3  ;;  %v3984_v21 = vsub.f32 %v3854_v16, %v3881_v41 }
 0x277   : > { %v3992_v2 = vand.u32 4294901760, %v3991_v24  ;;  %v3980_v6 = vand.u32 4294901760, %v3979_v48 }
 0x278   : > { %v3973_v44 = vand.u32 4294901760, %v3972_v19  ;;  %5526 = vmatprep.subr.bf16.mxu1 %v5525_v17  ;;  %v3985_v42 = vand.u32 4294901760, %v3984_v21  ;;  %v5541_v26 = vpack.c.bf16 %v3984_v21, %v3977_v10 }
 0x279   : > { %5528 = vmatpush3.bf16.msra.mxu1 %v5525_v17  ;;  %v3993_v59 = vsub.f32 %v3991_v24, %v3992_v2 }
 0x27a   : > { %v5529_v36 = vpack.c.bf16 %v3973_v44, %v3966_v11  ;;  %5355 = vmatprep.subr.mxu1 %v7063_v35  ;;  %v3986_v51 = vsub.f32 %v3984_v21, %v3985_v42  ;;  %v5557_v57 = vpack.c.bf16 %v3985_v42, %v3978_v62 }
 0x27b   : > { %v3994_v34 = vand.u32 4294901760, %v3993_v59 }
 0x27c   : > { %v3987_v31 = vand.u32 4294901760, %v3986_v51 }
 0x27d   : > { %5356 = vmatpush3.msra.mxu1 %v7063_v35 }
 0x27e   : > { %5530 = vmatprep.subr.bf16.mxu1 %v5529_v36  ;;  %5358 = vmatmul.mubr.f32.vlgmr.msra.gmra.mrb[10].mxu1 %v3955_v53  ;;  %v5533_v28 = vpack.c.bf16 %v3987_v31, %v3980_v6 }
 0x27f   : > { %5532 = vmatpush3.bf16.msra.mxu1 %v5529_v36  ;;  %5370 = vmatprep.mubr.f32.mxu1 %v7042_v1 }
 0x280   : > { %5534 = vmatprep.subr.bf16.mxu1 %v5533_v28 }
 0x283   : > { %5536 = vmatpush3.bf16.msra.mxu1 %v5533_v28 }
 0x284   : > { %5368 = vmatprep.subr.mxu1 %v3994_v34 }
 0x287   : > { %5369 = vmatpush3.msra.mxu1 %v3994_v34 }
 0x288   : > { %5538 = vmatprep.subr.bf16.mxu1 %v5537_v50  ;;  %5371 = vmatmul.mubr.f32.vlgmr.msra.gmra.mrb[10].mxu1 %v7055_v38 }
 0x289   : > { %5540 = vmatpush3.bf16.msra.mxu1 %v5537_v50  ;;  %5383 = vmatprep.mubr.f32.mxu1 %v7045_v25 }
 0x28a   : > { %5542 = vmatprep.subr.bf16.mxu1 %v5541_v26 }
 0x28d   : > { %5544 = vmatpush3.bf16.msra.mxu1 %v5541_v26 }
 0x28e   : > { %5381 = vmatprep.subr.mxu1 %v3991_v24 }
 0x291   : > { %5382 = vmatpush3.msra.mxu1 %v3991_v24 }
 0x292   : > { %5546 = vmatprep.subr.bf16.mxu1 %v7060_v5  ;;  %5384 = vmatmul.mubr.f32.vlgmr.msra.gmra.mrb[10].mxu1 %v7058_v23 }
 0x293   : > { %5548 = vmatpush3.bf16.msra.mxu1 %v7060_v5  ;;  %5396 = vmatprep.mubr.f32.mxu1 %v3943_v20 }
 0x294   : > { %5550 = vmatprep.subr.bf16.mxu1 %v5525_v17 }
 0x297   : > { %5552 = vmatpush3.bf16.msra.mxu1 %v5525_v17 }
 0x298   : > { %5394 = vmatprep.subr.mxu1 %v7063_v35 }
 0x29b   : > { %5395 = vmatpush3.msra.mxu1 %v7063_v35 }
 0x29c   : > { %5554 = vmatprep.subr.bf16.mxu1 %v5553_v43  ;;  %5397 = vmatmul.mubr.f32.vlgmr.msra.gmra.mrb[10].mxu1 %v3953_v40 }
 0x29d   : > { %5556 = vmatpush3.bf16.msra.mxu1 %v5553_v43  ;;  %5409 = vmatprep.mubr.f32.mxu1 %v7042_v1 }
 0x29e   : > { %5558 = vmatprep.subr.bf16.mxu1 %v5557_v57 }
 0x2a1   : > { %5560 = vmatpush3.bf16.msra.mxu1 %v5557_v57 }
 0x2a2   : > { %5407 = vmatprep.subr.mxu1 %v3992_v2 }
 0x2a5   : > { %5408 = vmatpush3.msra.mxu1 %v3992_v2 }
 0x2a6   : > { %5562 = vmatprep.subr.bf16.mxu1 %v7060_v5  ;;  %5410 = vmatmul.mubr.f32.vlgmr.msra.gmra.mrb[10].mxu1 %v7055_v38 }
 0x2a7   : > { %5564 = vmatpush3.bf16.msra.mxu1 %v7060_v5  ;;  %5422 = vmatprep.mubr.f32.mxu1 %v7042_v1 }
 0x2a8   : > { %5566 = vmatprep.subr.bf16.mxu1 %v5525_v17 }
 0x2ab   : > { %5568 = vmatpush3.bf16.msra.mxu1 %v5525_v17 }
 0x2ac   : > { %5420 = vmatprep.subr.mxu1 %v7063_v35 }
 0x2af   : > { %5421 = vmatpush3.msra.mxu1 %v7063_v35 }
 0x2b0   : > { %5423 = vmatmul.mubr.f32.vlgmr.msra.gmra.mrb[10].mxu1 %v7055_v38 }
 0x383   : > { %v5424_v25 = vpop.f32.mrb[10].mxu1 }
 0x384   : > { %v4413_v20 = vmax.f32 %v5424_v25, 1e-05  ;;  %v4402_v33 = vpop.f32.mrb[11].mxu1 }
 0x385   : > { %v4412_v14 = vmax.f32 %v4402_v33, 1e-05 }
 0x386   : > { %5881 = vlog2.f32 %v4413_v20 }
 0x387   : > { %5883 = vlog2.f32 %v4412_v14 }
 0x390   : > { %v5882_v1 = vpop.eup %5881 }
 0x391   : > { %v5884_v8 = vpop.eup %5883  ;;  %v4417_v47 = vmul.f32 0.6931472, %v5882_v1 }
 0x392   : > { %v4415_v46 = vmul.f32 0.6931472, %v5884_v8 }
 0x393   : > { %4419 = vst [vmem:[%s187_s8 + $0x8] sm:$0xff] %v4417_v47 }
 0x394   : > { %4418 = vst [vmem:[%s187_s8] sm:$0xff] %v4415_v46 }
 0x395   : > { %5898 = shalt.err (!%p5895_p5)
}
 0x396   : > { %s5899_s28 = scalar_lea.hbm %s7096_s19, 256  ;;  %s5903_s4 = scalar_lea.hbm %s7147_s3, 512 }
 0x397   : > { %p5900_p6 = scmp.ne.s32.totalorder %s7096_s19, %s5899_s28  ;;  %p5904_p10 = scmp.lt.u32.totalorder %s7096_s19, %s7147_s3 }
 0x398   : > { %p5905_p11 = scmp.lt.u32.totalorder %s5903_s4, %s5899_s28  ;;  %p5907_p13 = scmp.lt.u32.totalorder %s5899_s28, %s7096_s19 }
 0x399   : > { %p5901_p7 = pnand %p5900_p6, %p6031_p4 }
 0x39a   : > { %p5906_p12 = por %p5905_p11, %p5904_p10 }
 0x39b   : > { %p5902_p9 = pneg %p5901_p7 }
 0x39c   : > { %p5908_p0 = por %p5907_p13, %p5906_p12 }
 0x39e   : > { %p5909_p1 = pnand %p5908_p0, %p5902_p9 }
 0x3a0   : > { %5912 = shalt.err (!%p5909_p1)
}
 0x3a1   : > { %s5969_s7 = smov 128   ;;  %s5970_s8 = smov 8  }
 0x3a2   : > { %5811 = dma.vmem_to_hbm [thread:$0]  (%p6031_p4), %s7091_s9, 256, %s7096_s19, %s7098_s21, %s5969_s7, %s5969_s7, %s5970_s8  }
 0x3a3 PF: > { %p5817_p2 = scmp.ge.s32.totalorder %s5963_s17, 2  ;;  %s4450_s10 = sand.u32 1, %s5943_s12  }
 0x3a4   : > { %s4451_s11 = scalar_lea.sflag [#allocation3], %s4450_s10 }
 0x3a5   : > { %p5814_p3 = pnand %p5817_p2, %p6038_p8 }
 0x3a7   : > { %5938 = dma.done.wait (!%p5814_p3), %s4451_s11, 256  }
 0x3a8   : > { %5940 = vsyncadd (!%p5814_p3), %s4451_s11, 4294967040  ;;  %s16_s17 = sadd.s32 1, %s5963_s17   ;;  %s7354_s12 = smov %s5947_s13 }
 0x3a9   : > { %p13_p5 = scmp.ge.s32.totalorder %s16_s17, 4   ;;  %s7355_s13 = smov %s5951_s14 }
 0x3aa   : > { %s7356_s14 = smov %s6044_s25  ;;  %s7357_s15 = smov %s5959_s16 }
 0x3ab   : > { %s7358_s16 = smov %s7360_s20  ;;  %15 = sbr.rel (!%p13_p5) target bundleno = 4 (0x4), region = 70 }
 0x3b2   :  { %4456 = vsyncpa [#allocation3], 1 }
 0x3b3   :  { %4458 = vsyncpa [#allocation3 + $0x1], 1 }

</bundles_post_ra>
